<compile_context>
chip_gen: v7x
topology: tpu7x:2x2x1
jax: 0.10.0
libtpu: 0.0.40
codegen_flags: <defaults>
</compile_context>

<pallas_src>
import jax
import jax.numpy as jnp
from jax.experimental import pallas as pl
from jax.experimental.pallas import tpu as pltpu

# ---- model hyper-parameters (small, synthetic CLIP text tower) -------------
N_BATCH = 2      # number of prompts
SEQ_LEN = 8      # context length
WIDTH = 32       # transformer width D
N_HEADS = 2      # attention heads
N_LAYERS = 2     # transformer layers
MLP_DIM = 4 * WIDTH
EMBED_DIM = 32   # text_projection output dim
EMBED_PAD = 128  # lane-dense padded output width (sliced back in wrapper)

HEAD_DIM = WIDTH // N_HEADS
NL = N_BATCH * SEQ_LEN           # folded batch*seq rows


def _layernorm(x, g, b, eps=1e-5):
    mu = jnp.mean(x, axis=-1, keepdims=True)
    xc = x - mu
    var = jnp.mean(xc * xc, axis=-1, keepdims=True)
    return xc * jax.lax.rsqrt(var + eps) * g + b


def text_encoder_kernel(
    prompts_ref,               # (NL, D)      f32   folded (batch*seq) prompt embeddings
    pos_ref,                   # (NL, D)      f32   positional embedding tiled per prompt
    bias_ref,                  # (H*NL, NL)   f32   causal + cross-prompt additive bias
    ln1_g_ref, ln1_b_ref,      # (Ly, 1, D)   f32
    wq_ref, bq_ref,            # (Ly, H, D, D) bf16 (head-lane masked, 1/sqrt(hd) folded) / (Ly, H, 1, D) f32
    wk_ref, bk_ref,            # (Ly, D, D)   bf16 / (Ly, 1, D) f32
    wv_ref, bv_ref,            # (Ly, D, D)   bf16 / (Ly, 1, D) f32
    wo_ref, bo_ref,            # (Ly, H, D, D) bf16 (non-head input rows zeroed) / (Ly, 1, D) f32
    ln2_g_ref, ln2_b_ref,      # (Ly, 1, D)   f32
    w1_ref, b1_ref,            # (Ly, D, 4D)  bf16 / (Ly, 1, 4D) f32
    w2_ref, b2_ref,            # (Ly, 4D, D)  bf16 / (Ly, 1, D) f32
    lnf_g_ref, lnf_b_ref,      # (1, D)       f32
    tproj_ref,                 # (D, Ep)      bf16  (E padded to 128 lanes)
    eot_ref,                   # (N,)         int32 SMEM — flat EOT row indices
    out_ref,                   # (N, Ep)      f32
    xf_ref,                    # (NL, D)      f32   VMEM scratch (final residual)
):
    nl, D = prompts_ref.shape

    x = prompts_ref[...] + pos_ref[...]                         # (NL, D) f32
    bias = bias_ref[...]                                        # (H*NL, NL)

    for layer in range(N_LAYERS):                               # unrolled (2 layers)
        # ---- residual attention -------------------------------------------
        h = _layernorm(x, ln1_g_ref[layer], ln1_b_ref[layer])   # (NL, D) f32
        hb = h.astype(jnp.bfloat16)

        # Per-head q via lane-masked, pre-scaled weights; stack heads on sublanes.
        q_parts = []
        for hi in range(N_HEADS):
            qh = jnp.dot(hb, wq_ref[layer, hi],
                         preferred_element_type=jnp.float32) + bq_ref[layer, hi]
            q_parts.append(qh)                                   # (NL, D), only head-hi lanes nonzero
        q_stack = jnp.concatenate(q_parts, axis=0)               # (H*NL, D)

        k = jnp.dot(hb, wk_ref[layer],
                    preferred_element_type=jnp.float32) + bk_ref[layer]   # (NL, D)
        v = jnp.dot(hb, wv_ref[layer],
                    preferred_element_type=jnp.float32) + bv_ref[layer]   # (NL, D)

        # One score matmul for all heads & prompts (head-hi rows only pick up
        # head-hi lanes of k because q_stack is lane-masked per head).
        s = jnp.einsum("rd,kd->rk",
                       q_stack.astype(jnp.bfloat16), k.astype(jnp.bfloat16),
                       preferred_element_type=jnp.float32)        # (H*NL, NL)
        s = s + bias
        s = s - jnp.max(s, axis=-1, keepdims=True)
        p = jnp.exp(s)
        p = p * pl.reciprocal(jnp.sum(p, axis=-1, keepdims=True), approx=True)

        # One context matmul for all heads & prompts.
        o = jnp.dot(p.astype(jnp.bfloat16), v.astype(jnp.bfloat16),
                    preferred_element_type=jnp.float32)           # (H*NL, D)

        # Output projection: wo passed per head with non-head input rows zeroed,
        # so head separation needs no lane slicing / reshaping.
        attn = bo_ref[layer]                                      # (1, D) broadcasts up
        for hi in range(N_HEADS):
            attn = attn + jnp.dot(
                o[hi * nl:(hi + 1) * nl].astype(jnp.bfloat16), wo_ref[layer, hi],
                preferred_element_type=jnp.float32)
        x = x + attn

        # ---- residual MLP (QuickGELU) --------------------------------------
        h = _layernorm(x, ln2_g_ref[layer], ln2_b_ref[layer])
        h1 = jnp.dot(h.astype(jnp.bfloat16), w1_ref[layer],
                     preferred_element_type=jnp.float32) + b1_ref[layer]   # (NL, 4D)
        h1 = h1 * jax.nn.sigmoid(1.702 * h1)                               # QuickGELU (f32)
        h2 = jnp.dot(h1.astype(jnp.bfloat16), w2_ref[layer],
                     preferred_element_type=jnp.float32) + b2_ref[layer]
        x = x + h2

    # ---- EOT gather (SMEM indices), ln_final on selected rows, projection --
    xf_ref[...] = x
    rows = [xf_ref[pl.ds(eot_ref[n], 1), :] for n in range(N_BATCH)]        # N x (1, D)
    sel = jnp.concatenate(rows, axis=0)                                      # (N, D)
    sel = _layernorm(sel, lnf_g_ref[...], lnf_b_ref[...])
    out_ref[...] = jnp.dot(sel.astype(jnp.bfloat16), tproj_ref[...],
                           preferred_element_type=jnp.float32)               # (N, Ep)


def make_params(key):
    """Deterministic synthetic CLIP-text-transformer parameters (f32)."""
    ks = jax.random.split(key, 16)
    s = 0.02
    params = dict(
        pos=jax.random.normal(ks[0], (SEQ_LEN, WIDTH), jnp.float32) * s,
        ln1_g=jnp.ones((N_LAYERS, WIDTH), jnp.float32),
        ln1_b=jnp.zeros((N_LAYERS, WIDTH), jnp.float32),
        wqkv=jax.random.normal(ks[1], (N_LAYERS, WIDTH, 3 * WIDTH), jnp.float32) * s,
        bqkv=jnp.zeros((N_LAYERS, 3 * WIDTH), jnp.float32),
        wo=jax.random.normal(ks[2], (N_LAYERS, WIDTH, WIDTH), jnp.float32) * s,
        bo=jnp.zeros((N_LAYERS, WIDTH), jnp.float32),
        ln2_g=jnp.ones((N_LAYERS, WIDTH), jnp.float32),
        ln2_b=jnp.zeros((N_LAYERS, WIDTH), jnp.float32),
        w1=jax.random.normal(ks[3], (N_LAYERS, WIDTH, MLP_DIM), jnp.float32) * s,
        b1=jnp.zeros((N_LAYERS, MLP_DIM), jnp.float32),
        w2=jax.random.normal(ks[4], (N_LAYERS, MLP_DIM, WIDTH), jnp.float32) * s,
        b2=jnp.zeros((N_LAYERS, WIDTH), jnp.float32),
        lnf_g=jnp.ones((1, WIDTH), jnp.float32),
        lnf_b=jnp.zeros((1, WIDTH), jnp.float32),
        tproj=jax.random.normal(ks[5], (WIDTH, EMBED_DIM), jnp.float32)
        * (WIDTH ** -0.5),
    )
    return params


def _build_attn_bias():
    """(H*NL, NL) additive bias: causal within each prompt, -1e9 across prompts."""
    row_n = jnp.repeat(jnp.arange(N_BATCH), SEQ_LEN)          # prompt id per row
    row_l = jnp.tile(jnp.arange(SEQ_LEN), N_BATCH)            # position per row
    same_prompt = row_n[:, None] == row_n[None, :]
    causal = row_l[None, :] <= row_l[:, None]
    ok = jnp.logical_and(same_prompt, causal)                  # (NL, NL)
    bias_nl = jnp.where(ok, 0.0, -1e9).astype(jnp.float32)
    return jnp.tile(bias_nl, (N_HEADS, 1))                     # (H*NL, NL)


@jax.jit
def text_encoder(prompts, tokenized_prompts, params):
    """prompts: (N, L, D) float32 embeddings; tokenized_prompts: (N, L) int32."""
    N, L, D = prompts.shape
    H, hd = N_HEADS, HEAD_DIM
    nl = N * L

    # ---- layout plumbing (all in the wrapper: free at trace time) ----------
    prompts2d = prompts.reshape(nl, D)
    pos2d = jnp.tile(params["pos"], (N, 1))                    # (NL, D)
    attn_bias = _build_attn_bias()                             # (H*NL, NL)

    # EOT flat row indices in the folded layout -> SMEM scalars.
    eot_flat = (jnp.arange(N, dtype=jnp.int32) * L
                + jnp.argmax(tokenized_prompts, axis=-1).astype(jnp.int32))  # (N,)

    # Split fused qkv weights; build lane-masked per-head q weights
    # (1/sqrt(hd) folded in) and per-head row-masked output-projection weights.
    lane = jnp.arange(D)
    head_mask = jnp.stack(
        [(lane // hd == hi).astype(jnp.float32) for hi in range(H)])   # (H, D)
    scale = float(hd) ** -0.5

    wqkv, bqkv = params["wqkv"], params["bqkv"]
    wq, wk, wv = wqkv[:, :, :D], wqkv[:, :, D:2 * D], wqkv[:, :, 2 * D:]
    bq, bk, bv = bqkv[:, :D], bqkv[:, D:2 * D], bqkv[:, 2 * D:]

    wq_h = (wq[:, None, :, :] * head_mask[None, :, None, :] * scale
            ).astype(jnp.bfloat16)                               # (Ly, H, D, D)
    bq_h = (bq[:, None, :] * head_mask[None, :, :] * scale)[:, :, None, :]  # (Ly, H, 1, D)
    wo_h = (params["wo"][:, None, :, :] * head_mask[None, :, :, None]
            ).astype(jnp.bfloat16)                               # (Ly, H, D, D)

    # Pad text_projection to a lane-dense (D, 128) tile; slice output back.
    tproj = jnp.zeros((D, EMBED_PAD), jnp.float32).at[:, :EMBED_DIM].set(
        params["tproj"]).astype(jnp.bfloat16)

    inputs = (
        prompts2d, pos2d, attn_bias,
        params["ln1_g"][:, None, :], params["ln1_b"][:, None, :],
        wq_h, bq_h,
        wk.astype(jnp.bfloat16), bk[:, None, :],
        wv.astype(jnp.bfloat16), bv[:, None, :],
        wo_h, params["bo"][:, None, :],
        params["ln2_g"][:, None, :], params["ln2_b"][:, None, :],
        params["w1"].astype(jnp.bfloat16), params["b1"][:, None, :],
        params["w2"].astype(jnp.bfloat16), params["b2"][:, None, :],
        params["lnf_g"], params["lnf_b"],
        tproj,
        eot_flat,
    )

    vmem = pl.BlockSpec(memory_space=pltpu.MemorySpace.VMEM)
    smem = pl.BlockSpec(memory_space=pltpu.MemorySpace.SMEM)

    out = pl.pallas_call(
        text_encoder_kernel,
        out_shape=jax.ShapeDtypeStruct((N, EMBED_PAD), jnp.float32),
        in_specs=[vmem] * (len(inputs) - 1) + [smem],   # last input (eot idx) -> SMEM
        out_specs=vmem,
        scratch_shapes=[pltpu.VMEM((nl, D), jnp.float32)],
    )(*inputs)

    return out[:, :EMBED_DIM]


if __name__ == "__main__":
    key = jax.random.PRNGKey(0)
    kp, kx, kt = jax.random.split(key, 3)
    params = make_params(kp)

    prompts = jax.random.normal(kx, (N_BATCH, SEQ_LEN, WIDTH), jnp.float32)
    tokenized_prompts = jax.random.randint(
        kt, (N_BATCH, SEQ_LEN), minval=0, maxval=1000, dtype=jnp.int32
    )

    out = text_encoder(prompts, tokenized_prompts, params)
    jax.block_until_ready(out)
    assert out.shape == (N_BATCH, EMBED_DIM) and out.dtype == jnp.float32
    print("KERNEL_OK")
</pallas_src>

<mosaic_0001>
module attributes {stable_mosaic.version = 11 : i64} {
  func.func @text_encoder_kernel(%arg0: memref<16x32xf32, #tpu.memory_space<vmem>>, %arg1: memref<16x32xf32, #tpu.memory_space<vmem>>, %arg2: memref<32x16xf32, #tpu.memory_space<vmem>>, %arg3: memref<2x1x32xf32, #tpu.memory_space<vmem>>, %arg4: memref<2x1x32xf32, #tpu.memory_space<vmem>>, %arg5: memref<2x2x32x32xbf16, #tpu.memory_space<vmem>>, %arg6: memref<2x2x1x32xf32, #tpu.memory_space<vmem>>, %arg7: memref<2x32x32xbf16, #tpu.memory_space<vmem>>, %arg8: memref<2x1x32xf32, #tpu.memory_space<vmem>>, %arg9: memref<2x32x32xbf16, #tpu.memory_space<vmem>>, %arg10: memref<2x1x32xf32, #tpu.memory_space<vmem>>, %arg11: memref<2x2x32x32xbf16, #tpu.memory_space<vmem>>, %arg12: memref<2x1x32xf32, #tpu.memory_space<vmem>>, %arg13: memref<2x1x32xf32, #tpu.memory_space<vmem>>, %arg14: memref<2x1x32xf32, #tpu.memory_space<vmem>>, %arg15: memref<2x32x128xbf16, #tpu.memory_space<vmem>>, %arg16: memref<2x1x128xf32, #tpu.memory_space<vmem>>, %arg17: memref<2x128x32xbf16, #tpu.memory_space<vmem>>, %arg18: memref<2x1x32xf32, #tpu.memory_space<vmem>>, %arg19: memref<1x32xf32, #tpu.memory_space<vmem>>, %arg20: memref<1x32xf32, #tpu.memory_space<vmem>>, %arg21: memref<32x128xbf16, #tpu.memory_space<vmem>>, %arg22: memref<2xi32, #tpu.memory_space<smem>>, %arg23: memref<2x128xf32, #tpu.memory_space<vmem>>, %arg24: memref<16x32xf32, #tpu.memory_space<vmem>>) attributes {dimension_semantics = [], scalar_prefetch = 0 : i64, scratch_operands = 1 : i64, tpu.core_type = #tpu.core_type<tc>} {
    %c0 = arith.constant 0 : index
    %c0_0 = arith.constant 0 : index
    %0 = vector.load %arg0[%c0, %c0_0] : memref<16x32xf32, #tpu.memory_space<vmem>>, vector<16x32xf32>
    %c0_1 = arith.constant 0 : index
    %c0_2 = arith.constant 0 : index
    %1 = vector.load %arg1[%c0_1, %c0_2] : memref<16x32xf32, #tpu.memory_space<vmem>>, vector<16x32xf32>
    %2 = arith.addf %0, %1 : vector<16x32xf32>
    %c0_3 = arith.constant 0 : index
    %c0_4 = arith.constant 0 : index
    %3 = vector.load %arg2[%c0_3, %c0_4] : memref<32x16xf32, #tpu.memory_space<vmem>>, vector<32x16xf32>
    %c0_5 = arith.constant 0 : index
    %c0_6 = arith.constant 0 : index
    %c0_7 = arith.constant 0 : index
    %4 = vector.load %arg3[%c0_5, %c0_6, %c0_7] : memref<2x1x32xf32, #tpu.memory_space<vmem>>, vector<1x1x32xf32>
    %5 = vector.shape_cast %4 : vector<1x1x32xf32> to vector<1x32xf32>
    %c0_8 = arith.constant 0 : index
    %c0_9 = arith.constant 0 : index
    %c0_10 = arith.constant 0 : index
    %6 = vector.load %arg4[%c0_8, %c0_9, %c0_10] : memref<2x1x32xf32, #tpu.memory_space<vmem>>, vector<1x1x32xf32>
    %7 = vector.shape_cast %6 : vector<1x1x32xf32> to vector<1x32xf32>
    %cst = arith.constant dense<0.000000e+00> : vector<16xf32>
    %8 = vector.multi_reduction <add>, %2, %cst [1] : vector<16x32xf32> to vector<16xf32>
    %9 = vector.shape_cast %8 : vector<16xf32> to vector<16x1xf32>
    %cst_11 = arith.constant 3.200000e+01 : f32
    %10 = vector.broadcast %cst_11 : f32 to vector<16x1xf32>
    %11 = arith.divf %9, %10 : vector<16x1xf32>
    %12 = vector.broadcast %11 : vector<16x1xf32> to vector<16x32xf32>
    %13 = arith.subf %2, %12 : vector<16x32xf32>
    %14 = arith.mulf %13, %13 : vector<16x32xf32>
    %cst_12 = arith.constant dense<0.000000e+00> : vector<16xf32>
    %15 = vector.multi_reduction <add>, %14, %cst_12 [1] : vector<16x32xf32> to vector<16xf32>
    %16 = vector.shape_cast %15 : vector<16xf32> to vector<16x1xf32>
    %cst_13 = arith.constant 3.200000e+01 : f32
    %17 = vector.broadcast %cst_13 : f32 to vector<16x1xf32>
    %18 = arith.divf %16, %17 : vector<16x1xf32>
    %cst_14 = arith.constant 9.99999974E-6 : f32
    %19 = vector.broadcast %cst_14 : f32 to vector<16x1xf32>
    %20 = arith.addf %18, %19 : vector<16x1xf32>
    %21 = math.rsqrt %20 : vector<16x1xf32>
    %22 = vector.broadcast %21 : vector<16x1xf32> to vector<16x32xf32>
    %23 = arith.mulf %13, %22 : vector<16x32xf32>
    %24 = vector.broadcast %5 : vector<1x32xf32> to vector<16x32xf32>
    %25 = arith.mulf %23, %24 : vector<16x32xf32>
    %26 = vector.broadcast %7 : vector<1x32xf32> to vector<16x32xf32>
    %27 = arith.addf %25, %26 : vector<16x32xf32>
    %28 = arith.truncf %27 : vector<16x32xf32> to vector<16x32xbf16>
    %c0_15 = arith.constant 0 : index
    %c0_16 = arith.constant 0 : index
    %c0_17 = arith.constant 0 : index
    %c0_18 = arith.constant 0 : index
    %29 = vector.load %arg5[%c0_15, %c0_16, %c0_17, %c0_18] : memref<2x2x32x32xbf16, #tpu.memory_space<vmem>>, vector<1x1x32x32xbf16>
    %30 = vector.shape_cast %29 : vector<1x1x32x32xbf16> to vector<32x32xbf16>
    %cst_19 = arith.constant dense<0.000000e+00> : vector<16x32xf32>
    %31 = tpu.matmul %28, %30, %cst_19 {dimension_numbers = #tpu.dot_dimension_numbers<[1], [0], [0], [1], [0, 0, 1, 1], [], []>} : vector<16x32xbf16>, vector<32x32xbf16>, vector<16x32xf32> -> vector<16x32xf32>
    %c0_20 = arith.constant 0 : index
    %c0_21 = arith.constant 0 : index
    %c0_22 = arith.constant 0 : index
    %c0_23 = arith.constant 0 : index
    %32 = vector.load %arg6[%c0_20, %c0_21, %c0_22, %c0_23] : memref<2x2x1x32xf32, #tpu.memory_space<vmem>>, vector<1x1x1x32xf32>
    %33 = vector.shape_cast %32 : vector<1x1x1x32xf32> to vector<1x32xf32>
    %34 = vector.broadcast %33 : vector<1x32xf32> to vector<16x32xf32>
    %35 = arith.addf %31, %34 : vector<16x32xf32>
    %c0_24 = arith.constant 0 : index
    %c1 = arith.constant 1 : index
    %c0_25 = arith.constant 0 : index
    %c0_26 = arith.constant 0 : index
    %36 = vector.load %arg5[%c0_24, %c1, %c0_25, %c0_26] : memref<2x2x32x32xbf16, #tpu.memory_space<vmem>>, vector<1x1x32x32xbf16>
    %37 = vector.shape_cast %36 : vector<1x1x32x32xbf16> to vector<32x32xbf16>
    %cst_27 = arith.constant dense<0.000000e+00> : vector<16x32xf32>
    %38 = tpu.matmul %28, %37, %cst_27 {dimension_numbers = #tpu.dot_dimension_numbers<[1], [0], [0], [1], [0, 0, 1, 1], [], []>} : vector<16x32xbf16>, vector<32x32xbf16>, vector<16x32xf32> -> vector<16x32xf32>
    %c0_28 = arith.constant 0 : index
    %c1_29 = arith.constant 1 : index
    %c0_30 = arith.constant 0 : index
    %c0_31 = arith.constant 0 : index
    %39 = vector.load %arg6[%c0_28, %c1_29, %c0_30, %c0_31] : memref<2x2x1x32xf32, #tpu.memory_space<vmem>>, vector<1x1x1x32xf32>
    %40 = vector.shape_cast %39 : vector<1x1x1x32xf32> to vector<1x32xf32>
    %41 = vector.broadcast %40 : vector<1x32xf32> to vector<16x32xf32>
    %42 = arith.addf %38, %41 : vector<16x32xf32>
    %43 = tpu.concatenate %35, %42 in 0 : vector<16x32xf32>, vector<16x32xf32> -> vector<32x32xf32>
    %c0_32 = arith.constant 0 : index
    %c0_33 = arith.constant 0 : index
    %c0_34 = arith.constant 0 : index
    %44 = vector.load %arg7[%c0_32, %c0_33, %c0_34] : memref<2x32x32xbf16, #tpu.memory_space<vmem>>, vector<1x32x32xbf16>
    %45 = vector.shape_cast %44 : vector<1x32x32xbf16> to vector<32x32xbf16>
    %cst_35 = arith.constant dense<0.000000e+00> : vector<16x32xf32>
    %46 = tpu.matmul %28, %45, %cst_35 {dimension_numbers = #tpu.dot_dimension_numbers<[1], [0], [0], [1], [0, 0, 1, 1], [], []>} : vector<16x32xbf16>, vector<32x32xbf16>, vector<16x32xf32> -> vector<16x32xf32>
    %c0_36 = arith.constant 0 : index
    %c0_37 = arith.constant 0 : index
    %c0_38 = arith.constant 0 : index
    %47 = vector.load %arg8[%c0_36, %c0_37, %c0_38] : memref<2x1x32xf32, #tpu.memory_space<vmem>>, vector<1x1x32xf32>
    %48 = vector.shape_cast %47 : vector<1x1x32xf32> to vector<1x32xf32>
    %49 = vector.broadcast %48 : vector<1x32xf32> to vector<16x32xf32>
    %50 = arith.addf %46, %49 : vector<16x32xf32>
    %c0_39 = arith.constant 0 : index
    %c0_40 = arith.constant 0 : index
    %c0_41 = arith.constant 0 : index
    %51 = vector.load %arg9[%c0_39, %c0_40, %c0_41] : memref<2x32x32xbf16, #tpu.memory_space<vmem>>, vector<1x32x32xbf16>
    %52 = vector.shape_cast %51 : vector<1x32x32xbf16> to vector<32x32xbf16>
    %cst_42 = arith.constant dense<0.000000e+00> : vector<16x32xf32>
    %53 = tpu.matmul %28, %52, %cst_42 {dimension_numbers = #tpu.dot_dimension_numbers<[1], [0], [0], [1], [0, 0, 1, 1], [], []>} : vector<16x32xbf16>, vector<32x32xbf16>, vector<16x32xf32> -> vector<16x32xf32>
    %c0_43 = arith.constant 0 : index
    %c0_44 = arith.constant 0 : index
    %c0_45 = arith.constant 0 : index
    %54 = vector.load %arg10[%c0_43, %c0_44, %c0_45] : memref<2x1x32xf32, #tpu.memory_space<vmem>>, vector<1x1x32xf32>
    %55 = vector.shape_cast %54 : vector<1x1x32xf32> to vector<1x32xf32>
    %56 = vector.broadcast %55 : vector<1x32xf32> to vector<16x32xf32>
    %57 = arith.addf %53, %56 : vector<16x32xf32>
    %58 = arith.truncf %43 : vector<32x32xf32> to vector<32x32xbf16>
    %59 = arith.truncf %50 : vector<16x32xf32> to vector<16x32xbf16>
    "tpu.trace_start"() <{level = 10 : i32, message = "rd,kd->rk"}> : () -> ()
    %cst_46 = arith.constant dense<0.000000e+00> : vector<32x16xf32>
    %60 = tpu.matmul %58, %59, %cst_46 {dimension_numbers = #tpu.dot_dimension_numbers<[1], [1], [0], [0], [0, 0, 1, 0], [], []>} : vector<32x32xbf16>, vector<16x32xbf16>, vector<32x16xf32> -> vector<32x16xf32>
    "tpu.trace_stop"() : () -> ()
    %61 = arith.addf %60, %3 : vector<32x16xf32>
    %cst_47 = arith.constant dense<0xFF800000> : vector<32xf32>
    %62 = vector.multi_reduction <maximumf>, %61, %cst_47 [1] : vector<32x16xf32> to vector<32xf32>
    %63 = vector.shape_cast %62 : vector<32xf32> to vector<32x1xf32>
    %64 = vector.broadcast %63 : vector<32x1xf32> to vector<32x16xf32>
    %65 = arith.subf %61, %64 : vector<32x16xf32>
    %66 = math.exp %65 : vector<32x16xf32>
    %cst_48 = arith.constant dense<0.000000e+00> : vector<32xf32>
    %67 = vector.multi_reduction <add>, %66, %cst_48 [1] : vector<32x16xf32> to vector<32xf32>
    %68 = vector.shape_cast %67 : vector<32xf32> to vector<32x1xf32>
    %69 = tpu.reciprocal %68 {approx = true} : vector<32x1xf32> -> vector<32x1xf32>
    %70 = vector.broadcast %69 : vector<32x1xf32> to vector<32x16xf32>
    %71 = arith.mulf %66, %70 : vector<32x16xf32>
    %72 = arith.truncf %71 : vector<32x16xf32> to vector<32x16xbf16>
    %73 = arith.truncf %57 : vector<16x32xf32> to vector<16x32xbf16>
    %cst_49 = arith.constant dense<0.000000e+00> : vector<32x32xf32>
    %74 = tpu.matmul %72, %73, %cst_49 {dimension_numbers = #tpu.dot_dimension_numbers<[1], [0], [0], [1], [0, 0, 1, 1], [], []>} : vector<32x16xbf16>, vector<16x32xbf16>, vector<32x32xf32> -> vector<32x32xf32>
    %c0_50 = arith.constant 0 : index
    %c0_51 = arith.constant 0 : index
    %c0_52 = arith.constant 0 : index
    %75 = vector.load %arg12[%c0_50, %c0_51, %c0_52] : memref<2x1x32xf32, #tpu.memory_space<vmem>>, vector<1x1x32xf32>
    %76 = vector.shape_cast %75 : vector<1x1x32xf32> to vector<1x32xf32>
    %77 = vector.extract_strided_slice %74 {offsets = [0, 0], sizes = [16, 32], strides = [1, 1]} : vector<32x32xf32> to vector<16x32xf32>
    %78 = arith.truncf %77 : vector<16x32xf32> to vector<16x32xbf16>
    %c0_53 = arith.constant 0 : index
    %c0_54 = arith.constant 0 : index
    %c0_55 = arith.constant 0 : index
    %c0_56 = arith.constant 0 : index
    %79 = vector.load %arg11[%c0_53, %c0_54, %c0_55, %c0_56] : memref<2x2x32x32xbf16, #tpu.memory_space<vmem>>, vector<1x1x32x32xbf16>
    %80 = vector.shape_cast %79 : vector<1x1x32x32xbf16> to vector<32x32xbf16>
    %cst_57 = arith.constant dense<0.000000e+00> : vector<16x32xf32>
    %81 = tpu.matmul %78, %80, %cst_57 {dimension_numbers = #tpu.dot_dimension_numbers<[1], [0], [0], [1], [0, 0, 1, 1], [], []>} : vector<16x32xbf16>, vector<32x32xbf16>, vector<16x32xf32> -> vector<16x32xf32>
    %82 = vector.broadcast %76 : vector<1x32xf32> to vector<16x32xf32>
    %83 = arith.addf %82, %81 : vector<16x32xf32>
    %84 = vector.extract_strided_slice %74 {offsets = [16, 0], sizes = [16, 32], strides = [1, 1]} : vector<32x32xf32> to vector<16x32xf32>
    %85 = arith.truncf %84 : vector<16x32xf32> to vector<16x32xbf16>
    %c0_58 = arith.constant 0 : index
    %c1_59 = arith.constant 1 : index
    %c0_60 = arith.constant 0 : index
    %c0_61 = arith.constant 0 : index
    %86 = vector.load %arg11[%c0_58, %c1_59, %c0_60, %c0_61] : memref<2x2x32x32xbf16, #tpu.memory_space<vmem>>, vector<1x1x32x32xbf16>
    %87 = vector.shape_cast %86 : vector<1x1x32x32xbf16> to vector<32x32xbf16>
    %cst_62 = arith.constant dense<0.000000e+00> : vector<16x32xf32>
    %88 = tpu.matmul %85, %87, %cst_62 {dimension_numbers = #tpu.dot_dimension_numbers<[1], [0], [0], [1], [0, 0, 1, 1], [], []>} : vector<16x32xbf16>, vector<32x32xbf16>, vector<16x32xf32> -> vector<16x32xf32>
    %89 = arith.addf %83, %88 : vector<16x32xf32>
    %90 = arith.addf %2, %89 : vector<16x32xf32>
    %c0_63 = arith.constant 0 : index
    %c0_64 = arith.constant 0 : index
    %c0_65 = arith.constant 0 : index
    %91 = vector.load %arg13[%c0_63, %c0_64, %c0_65] : memref<2x1x32xf32, #tpu.memory_space<vmem>>, vector<1x1x32xf32>
    %92 = vector.shape_cast %91 : vector<1x1x32xf32> to vector<1x32xf32>
    %c0_66 = arith.constant 0 : index
    %c0_67 = arith.constant 0 : index
    %c0_68 = arith.constant 0 : index
    %93 = vector.load %arg14[%c0_66, %c0_67, %c0_68] : memref<2x1x32xf32, #tpu.memory_space<vmem>>, vector<1x1x32xf32>
    %94 = vector.shape_cast %93 : vector<1x1x32xf32> to vector<1x32xf32>
    %cst_69 = arith.constant dense<0.000000e+00> : vector<16xf32>
    %95 = vector.multi_reduction <add>, %90, %cst_69 [1] : vector<16x32xf32> to vector<16xf32>
    %96 = vector.shape_cast %95 : vector<16xf32> to vector<16x1xf32>
    %cst_70 = arith.constant 3.200000e+01 : f32
    %97 = vector.broadcast %cst_70 : f32 to vector<16x1xf32>
    %98 = arith.divf %96, %97 : vector<16x1xf32>
    %99 = vector.broadcast %98 : vector<16x1xf32> to vector<16x32xf32>
    %100 = arith.subf %90, %99 : vector<16x32xf32>
    %101 = arith.mulf %100, %100 : vector<16x32xf32>
    %cst_71 = arith.constant dense<0.000000e+00> : vector<16xf32>
    %102 = vector.multi_reduction <add>, %101, %cst_71 [1] : vector<16x32xf32> to vector<16xf32>
    %103 = vector.shape_cast %102 : vector<16xf32> to vector<16x1xf32>
    %cst_72 = arith.constant 3.200000e+01 : f32
    %104 = vector.broadcast %cst_72 : f32 to vector<16x1xf32>
    %105 = arith.divf %103, %104 : vector<16x1xf32>
    %cst_73 = arith.constant 9.99999974E-6 : f32
    %106 = vector.broadcast %cst_73 : f32 to vector<16x1xf32>
    %107 = arith.addf %105, %106 : vector<16x1xf32>
    %108 = math.rsqrt %107 : vector<16x1xf32>
    %109 = vector.broadcast %108 : vector<16x1xf32> to vector<16x32xf32>
    %110 = arith.mulf %100, %109 : vector<16x32xf32>
    %111 = vector.broadcast %92 : vector<1x32xf32> to vector<16x32xf32>
    %112 = arith.mulf %110, %111 : vector<16x32xf32>
    %113 = vector.broadcast %94 : vector<1x32xf32> to vector<16x32xf32>
    %114 = arith.addf %112, %113 : vector<16x32xf32>
    %115 = arith.truncf %114 : vector<16x32xf32> to vector<16x32xbf16>
    %c0_74 = arith.constant 0 : index
    %c0_75 = arith.constant 0 : index
    %c0_76 = arith.constant 0 : index
    %116 = vector.load %arg15[%c0_74, %c0_75, %c0_76] : memref<2x32x128xbf16, #tpu.memory_space<vmem>>, vector<1x32x128xbf16>
    %117 = vector.shape_cast %116 : vector<1x32x128xbf16> to vector<32x128xbf16>
    %cst_77 = arith.constant dense<0.000000e+00> : vector<16x128xf32>
    %118 = tpu.matmul %115, %117, %cst_77 {dimension_numbers = #tpu.dot_dimension_numbers<[1], [0], [0], [1], [0, 0, 1, 1], [], []>} : vector<16x32xbf16>, vector<32x128xbf16>, vector<16x128xf32> -> vector<16x128xf32>
    %c0_78 = arith.constant 0 : index
    %c0_79 = arith.constant 0 : index
    %c0_80 = arith.constant 0 : index
    %119 = vector.load %arg16[%c0_78, %c0_79, %c0_80] : memref<2x1x128xf32, #tpu.memory_space<vmem>>, vector<1x1x128xf32>
    %120 = vector.shape_cast %119 : vector<1x1x128xf32> to vector<1x128xf32>
    %121 = vector.broadcast %120 : vector<1x128xf32> to vector<16x128xf32>
    %122 = arith.addf %118, %121 : vector<16x128xf32>
    %cst_81 = arith.constant 1.702000e+00 : f32
    %123 = vector.broadcast %cst_81 : f32 to vector<16x128xf32>
    %124 = arith.mulf %123, %122 : vector<16x128xf32>
    %125 = arith.negf %124 : vector<16x128xf32>
    %126 = math.exp %125 : vector<16x128xf32>
    %cst_82 = arith.constant 1.000000e+00 : f32
    %127 = vector.broadcast %cst_82 : f32 to vector<16x128xf32>
    %128 = arith.addf %127, %126 : vector<16x128xf32>
    %129 = arith.divf %127, %128 : vector<16x128xf32>
    %130 = arith.mulf %122, %129 : vector<16x128xf32>
    %131 = arith.truncf %130 : vector<16x128xf32> to vector<16x128xbf16>
    %c0_83 = arith.constant 0 : index
    %c0_84 = arith.constant 0 : index
    %c0_85 = arith.constant 0 : index
    %132 = vector.load %arg17[%c0_83, %c0_84, %c0_85] : memref<2x128x32xbf16, #tpu.memory_space<vmem>>, vector<1x128x32xbf16>
    %133 = vector.shape_cast %132 : vector<1x128x32xbf16> to vector<128x32xbf16>
    %cst_86 = arith.constant dense<0.000000e+00> : vector<16x32xf32>
    %134 = tpu.matmul %131, %133, %cst_86 {dimension_numbers = #tpu.dot_dimension_numbers<[1], [0], [0], [1], [0, 0, 1, 1], [], []>} : vector<16x128xbf16>, vector<128x32xbf16>, vector<16x32xf32> -> vector<16x32xf32>
    %c0_87 = arith.constant 0 : index
    %c0_88 = arith.constant 0 : index
    %c0_89 = arith.constant 0 : index
    %135 = vector.load %arg18[%c0_87, %c0_88, %c0_89] : memref<2x1x32xf32, #tpu.memory_space<vmem>>, vector<1x1x32xf32>
    %136 = vector.shape_cast %135 : vector<1x1x32xf32> to vector<1x32xf32>
    %137 = vector.broadcast %136 : vector<1x32xf32> to vector<16x32xf32>
    %138 = arith.addf %134, %137 : vector<16x32xf32>
    %139 = arith.addf %90, %138 : vector<16x32xf32>
    %c1_90 = arith.constant 1 : index
    %c0_91 = arith.constant 0 : index
    %c0_92 = arith.constant 0 : index
    %140 = vector.load %arg3[%c1_90, %c0_91, %c0_92] : memref<2x1x32xf32, #tpu.memory_space<vmem>>, vector<1x1x32xf32>
    %141 = vector.shape_cast %140 : vector<1x1x32xf32> to vector<1x32xf32>
    %c1_93 = arith.constant 1 : index
    %c0_94 = arith.constant 0 : index
    %c0_95 = arith.constant 0 : index
    %142 = vector.load %arg4[%c1_93, %c0_94, %c0_95] : memref<2x1x32xf32, #tpu.memory_space<vmem>>, vector<1x1x32xf32>
    %143 = vector.shape_cast %142 : vector<1x1x32xf32> to vector<1x32xf32>
    %cst_96 = arith.constant dense<0.000000e+00> : vector<16xf32>
    %144 = vector.multi_reduction <add>, %139, %cst_96 [1] : vector<16x32xf32> to vector<16xf32>
    %145 = vector.shape_cast %144 : vector<16xf32> to vector<16x1xf32>
    %cst_97 = arith.constant 3.200000e+01 : f32
    %146 = vector.broadcast %cst_97 : f32 to vector<16x1xf32>
    %147 = arith.divf %145, %146 : vector<16x1xf32>
    %148 = vector.broadcast %147 : vector<16x1xf32> to vector<16x32xf32>
    %149 = arith.subf %139, %148 : vector<16x32xf32>
    %150 = arith.mulf %149, %149 : vector<16x32xf32>
    %cst_98 = arith.constant dense<0.000000e+00> : vector<16xf32>
    %151 = vector.multi_reduction <add>, %150, %cst_98 [1] : vector<16x32xf32> to vector<16xf32>
    %152 = vector.shape_cast %151 : vector<16xf32> to vector<16x1xf32>
    %cst_99 = arith.constant 3.200000e+01 : f32
    %153 = vector.broadcast %cst_99 : f32 to vector<16x1xf32>
    %154 = arith.divf %152, %153 : vector<16x1xf32>
    %cst_100 = arith.constant 9.99999974E-6 : f32
    %155 = vector.broadcast %cst_100 : f32 to vector<16x1xf32>
    %156 = arith.addf %154, %155 : vector<16x1xf32>
    %157 = math.rsqrt %156 : vector<16x1xf32>
    %158 = vector.broadcast %157 : vector<16x1xf32> to vector<16x32xf32>
    %159 = arith.mulf %149, %158 : vector<16x32xf32>
    %160 = vector.broadcast %141 : vector<1x32xf32> to vector<16x32xf32>
    %161 = arith.mulf %159, %160 : vector<16x32xf32>
    %162 = vector.broadcast %143 : vector<1x32xf32> to vector<16x32xf32>
    %163 = arith.addf %161, %162 : vector<16x32xf32>
    %164 = arith.truncf %163 : vector<16x32xf32> to vector<16x32xbf16>
    %c1_101 = arith.constant 1 : index
    %c0_102 = arith.constant 0 : index
    %c0_103 = arith.constant 0 : index
    %c0_104 = arith.constant 0 : index
    %165 = vector.load %arg5[%c1_101, %c0_102, %c0_103, %c0_104] : memref<2x2x32x32xbf16, #tpu.memory_space<vmem>>, vector<1x1x32x32xbf16>
    %166 = vector.shape_cast %165 : vector<1x1x32x32xbf16> to vector<32x32xbf16>
    %cst_105 = arith.constant dense<0.000000e+00> : vector<16x32xf32>
    %167 = tpu.matmul %164, %166, %cst_105 {dimension_numbers = #tpu.dot_dimension_numbers<[1], [0], [0], [1], [0, 0, 1, 1], [], []>} : vector<16x32xbf16>, vector<32x32xbf16>, vector<16x32xf32> -> vector<16x32xf32>
    %c1_106 = arith.constant 1 : index
    %c0_107 = arith.constant 0 : index
    %c0_108 = arith.constant 0 : index
    %c0_109 = arith.constant 0 : index
    %168 = vector.load %arg6[%c1_106, %c0_107, %c0_108, %c0_109] : memref<2x2x1x32xf32, #tpu.memory_space<vmem>>, vector<1x1x1x32xf32>
    %169 = vector.shape_cast %168 : vector<1x1x1x32xf32> to vector<1x32xf32>
    %170 = vector.broadcast %169 : vector<1x32xf32> to vector<16x32xf32>
    %171 = arith.addf %167, %170 : vector<16x32xf32>
    %c1_110 = arith.constant 1 : index
    %c1_111 = arith.constant 1 : index
    %c0_112 = arith.constant 0 : index
    %c0_113 = arith.constant 0 : index
    %172 = vector.load %arg5[%c1_110, %c1_111, %c0_112, %c0_113] : memref<2x2x32x32xbf16, #tpu.memory_space<vmem>>, vector<1x1x32x32xbf16>
    %173 = vector.shape_cast %172 : vector<1x1x32x32xbf16> to vector<32x32xbf16>
    %cst_114 = arith.constant dense<0.000000e+00> : vector<16x32xf32>
    %174 = tpu.matmul %164, %173, %cst_114 {dimension_numbers = #tpu.dot_dimension_numbers<[1], [0], [0], [1], [0, 0, 1, 1], [], []>} : vector<16x32xbf16>, vector<32x32xbf16>, vector<16x32xf32> -> vector<16x32xf32>
    %c1_115 = arith.constant 1 : index
    %c1_116 = arith.constant 1 : index
    %c0_117 = arith.constant 0 : index
    %c0_118 = arith.constant 0 : index
    %175 = vector.load %arg6[%c1_115, %c1_116, %c0_117, %c0_118] : memref<2x2x1x32xf32, #tpu.memory_space<vmem>>, vector<1x1x1x32xf32>
    %176 = vector.shape_cast %175 : vector<1x1x1x32xf32> to vector<1x32xf32>
    %177 = vector.broadcast %176 : vector<1x32xf32> to vector<16x32xf32>
    %178 = arith.addf %174, %177 : vector<16x32xf32>
    %179 = tpu.concatenate %171, %178 in 0 : vector<16x32xf32>, vector<16x32xf32> -> vector<32x32xf32>
    %c1_119 = arith.constant 1 : index
    %c0_120 = arith.constant 0 : index
    %c0_121 = arith.constant 0 : index
    %180 = vector.load %arg7[%c1_119, %c0_120, %c0_121] : memref<2x32x32xbf16, #tpu.memory_space<vmem>>, vector<1x32x32xbf16>
    %181 = vector.shape_cast %180 : vector<1x32x32xbf16> to vector<32x32xbf16>
    %cst_122 = arith.constant dense<0.000000e+00> : vector<16x32xf32>
    %182 = tpu.matmul %164, %181, %cst_122 {dimension_numbers = #tpu.dot_dimension_numbers<[1], [0], [0], [1], [0, 0, 1, 1], [], []>} : vector<16x32xbf16>, vector<32x32xbf16>, vector<16x32xf32> -> vector<16x32xf32>
    %c1_123 = arith.constant 1 : index
    %c0_124 = arith.constant 0 : index
    %c0_125 = arith.constant 0 : index
    %183 = vector.load %arg8[%c1_123, %c0_124, %c0_125] : memref<2x1x32xf32, #tpu.memory_space<vmem>>, vector<1x1x32xf32>
    %184 = vector.shape_cast %183 : vector<1x1x32xf32> to vector<1x32xf32>
    %185 = vector.broadcast %184 : vector<1x32xf32> to vector<16x32xf32>
    %186 = arith.addf %182, %185 : vector<16x32xf32>
    %c1_126 = arith.constant 1 : index
    %c0_127 = arith.constant 0 : index
    %c0_128 = arith.constant 0 : index
    %187 = vector.load %arg9[%c1_126, %c0_127, %c0_128] : memref<2x32x32xbf16, #tpu.memory_space<vmem>>, vector<1x32x32xbf16>
    %188 = vector.shape_cast %187 : vector<1x32x32xbf16> to vector<32x32xbf16>
    %cst_129 = arith.constant dense<0.000000e+00> : vector<16x32xf32>
    %189 = tpu.matmul %164, %188, %cst_129 {dimension_numbers = #tpu.dot_dimension_numbers<[1], [0], [0], [1], [0, 0, 1, 1], [], []>} : vector<16x32xbf16>, vector<32x32xbf16>, vector<16x32xf32> -> vector<16x32xf32>
    %c1_130 = arith.constant 1 : index
    %c0_131 = arith.constant 0 : index
    %c0_132 = arith.constant 0 : index
    %190 = vector.load %arg10[%c1_130, %c0_131, %c0_132] : memref<2x1x32xf32, #tpu.memory_space<vmem>>, vector<1x1x32xf32>
    %191 = vector.shape_cast %190 : vector<1x1x32xf32> to vector<1x32xf32>
    %192 = vector.broadcast %191 : vector<1x32xf32> to vector<16x32xf32>
    %193 = arith.addf %189, %192 : vector<16x32xf32>
    %194 = arith.truncf %179 : vector<32x32xf32> to vector<32x32xbf16>
    %195 = arith.truncf %186 : vector<16x32xf32> to vector<16x32xbf16>
    "tpu.trace_start"() <{level = 10 : i32, message = "rd,kd->rk"}> : () -> ()
    %cst_133 = arith.constant dense<0.000000e+00> : vector<32x16xf32>
    %196 = tpu.matmul %194, %195, %cst_133 {dimension_numbers = #tpu.dot_dimension_numbers<[1], [1], [0], [0], [0, 0, 1, 0], [], []>} : vector<32x32xbf16>, vector<16x32xbf16>, vector<32x16xf32> -> vector<32x16xf32>
    "tpu.trace_stop"() : () -> ()
    %197 = arith.addf %196, %3 : vector<32x16xf32>
    %cst_134 = arith.constant dense<0xFF800000> : vector<32xf32>
    %198 = vector.multi_reduction <maximumf>, %197, %cst_134 [1] : vector<32x16xf32> to vector<32xf32>
    %199 = vector.shape_cast %198 : vector<32xf32> to vector<32x1xf32>
    %200 = vector.broadcast %199 : vector<32x1xf32> to vector<32x16xf32>
    %201 = arith.subf %197, %200 : vector<32x16xf32>
    %202 = math.exp %201 : vector<32x16xf32>
    %cst_135 = arith.constant dense<0.000000e+00> : vector<32xf32>
    %203 = vector.multi_reduction <add>, %202, %cst_135 [1] : vector<32x16xf32> to vector<32xf32>
    %204 = vector.shape_cast %203 : vector<32xf32> to vector<32x1xf32>
    %205 = tpu.reciprocal %204 {approx = true} : vector<32x1xf32> -> vector<32x1xf32>
    %206 = vector.broadcast %205 : vector<32x1xf32> to vector<32x16xf32>
    %207 = arith.mulf %202, %206 : vector<32x16xf32>
    %208 = arith.truncf %207 : vector<32x16xf32> to vector<32x16xbf16>
    %209 = arith.truncf %193 : vector<16x32xf32> to vector<16x32xbf16>
    %cst_136 = arith.constant dense<0.000000e+00> : vector<32x32xf32>
    %210 = tpu.matmul %208, %209, %cst_136 {dimension_numbers = #tpu.dot_dimension_numbers<[1], [0], [0], [1], [0, 0, 1, 1], [], []>} : vector<32x16xbf16>, vector<16x32xbf16>, vector<32x32xf32> -> vector<32x32xf32>
    %c1_137 = arith.constant 1 : index
    %c0_138 = arith.constant 0 : index
    %c0_139 = arith.constant 0 : index
    %211 = vector.load %arg12[%c1_137, %c0_138, %c0_139] : memref<2x1x32xf32, #tpu.memory_space<vmem>>, vector<1x1x32xf32>
    %212 = vector.shape_cast %211 : vector<1x1x32xf32> to vector<1x32xf32>
    %213 = vector.extract_strided_slice %210 {offsets = [0, 0], sizes = [16, 32], strides = [1, 1]} : vector<32x32xf32> to vector<16x32xf32>
    %214 = arith.truncf %213 : vector<16x32xf32> to vector<16x32xbf16>
    %c1_140 = arith.constant 1 : index
    %c0_141 = arith.constant 0 : index
    %c0_142 = arith.constant 0 : index
    %c0_143 = arith.constant 0 : index
    %215 = vector.load %arg11[%c1_140, %c0_141, %c0_142, %c0_143] : memref<2x2x32x32xbf16, #tpu.memory_space<vmem>>, vector<1x1x32x32xbf16>
    %216 = vector.shape_cast %215 : vector<1x1x32x32xbf16> to vector<32x32xbf16>
    %cst_144 = arith.constant dense<0.000000e+00> : vector<16x32xf32>
    %217 = tpu.matmul %214, %216, %cst_144 {dimension_numbers = #tpu.dot_dimension_numbers<[1], [0], [0], [1], [0, 0, 1, 1], [], []>} : vector<16x32xbf16>, vector<32x32xbf16>, vector<16x32xf32> -> vector<16x32xf32>
    %218 = vector.broadcast %212 : vector<1x32xf32> to vector<16x32xf32>
    %219 = arith.addf %218, %217 : vector<16x32xf32>
    %220 = vector.extract_strided_slice %210 {offsets = [16, 0], sizes = [16, 32], strides = [1, 1]} : vector<32x32xf32> to vector<16x32xf32>
    %221 = arith.truncf %220 : vector<16x32xf32> to vector<16x32xbf16>
    %c1_145 = arith.constant 1 : index
    %c1_146 = arith.constant 1 : index
    %c0_147 = arith.constant 0 : index
    %c0_148 = arith.constant 0 : index
    %222 = vector.load %arg11[%c1_145, %c1_146, %c0_147, %c0_148] : memref<2x2x32x32xbf16, #tpu.memory_space<vmem>>, vector<1x1x32x32xbf16>
    %223 = vector.shape_cast %222 : vector<1x1x32x32xbf16> to vector<32x32xbf16>
    %cst_149 = arith.constant dense<0.000000e+00> : vector<16x32xf32>
    %224 = tpu.matmul %221, %223, %cst_149 {dimension_numbers = #tpu.dot_dimension_numbers<[1], [0], [0], [1], [0, 0, 1, 1], [], []>} : vector<16x32xbf16>, vector<32x32xbf16>, vector<16x32xf32> -> vector<16x32xf32>
    %225 = arith.addf %219, %224 : vector<16x32xf32>
    %226 = arith.addf %139, %225 : vector<16x32xf32>
    %c1_150 = arith.constant 1 : index
    %c0_151 = arith.constant 0 : index
    %c0_152 = arith.constant 0 : index
    %227 = vector.load %arg13[%c1_150, %c0_151, %c0_152] : memref<2x1x32xf32, #tpu.memory_space<vmem>>, vector<1x1x32xf32>
    %228 = vector.shape_cast %227 : vector<1x1x32xf32> to vector<1x32xf32>
    %c1_153 = arith.constant 1 : index
    %c0_154 = arith.constant 0 : index
    %c0_155 = arith.constant 0 : index
    %229 = vector.load %arg14[%c1_153, %c0_154, %c0_155] : memref<2x1x32xf32, #tpu.memory_space<vmem>>, vector<1x1x32xf32>
    %230 = vector.shape_cast %229 : vector<1x1x32xf32> to vector<1x32xf32>
    %cst_156 = arith.constant dense<0.000000e+00> : vector<16xf32>
    %231 = vector.multi_reduction <add>, %226, %cst_156 [1] : vector<16x32xf32> to vector<16xf32>
    %232 = vector.shape_cast %231 : vector<16xf32> to vector<16x1xf32>
    %cst_157 = arith.constant 3.200000e+01 : f32
    %233 = vector.broadcast %cst_157 : f32 to vector<16x1xf32>
    %234 = arith.divf %232, %233 : vector<16x1xf32>
    %235 = vector.broadcast %234 : vector<16x1xf32> to vector<16x32xf32>
    %236 = arith.subf %226, %235 : vector<16x32xf32>
    %237 = arith.mulf %236, %236 : vector<16x32xf32>
    %cst_158 = arith.constant dense<0.000000e+00> : vector<16xf32>
    %238 = vector.multi_reduction <add>, %237, %cst_158 [1] : vector<16x32xf32> to vector<16xf32>
    %239 = vector.shape_cast %238 : vector<16xf32> to vector<16x1xf32>
    %cst_159 = arith.constant 3.200000e+01 : f32
    %240 = vector.broadcast %cst_159 : f32 to vector<16x1xf32>
    %241 = arith.divf %239, %240 : vector<16x1xf32>
    %cst_160 = arith.constant 9.99999974E-6 : f32
    %242 = vector.broadcast %cst_160 : f32 to vector<16x1xf32>
    %243 = arith.addf %241, %242 : vector<16x1xf32>
    %244 = math.rsqrt %243 : vector<16x1xf32>
    %245 = vector.broadcast %244 : vector<16x1xf32> to vector<16x32xf32>
    %246 = arith.mulf %236, %245 : vector<16x32xf32>
    %247 = vector.broadcast %228 : vector<1x32xf32> to vector<16x32xf32>
    %248 = arith.mulf %246, %247 : vector<16x32xf32>
    %249 = vector.broadcast %230 : vector<1x32xf32> to vector<16x32xf32>
    %250 = arith.addf %248, %249 : vector<16x32xf32>
    %251 = arith.truncf %250 : vector<16x32xf32> to vector<16x32xbf16>
    %c1_161 = arith.constant 1 : index
    %c0_162 = arith.constant 0 : index
    %c0_163 = arith.constant 0 : index
    %252 = vector.load %arg15[%c1_161, %c0_162, %c0_163] : memref<2x32x128xbf16, #tpu.memory_space<vmem>>, vector<1x32x128xbf16>
    %253 = vector.shape_cast %252 : vector<1x32x128xbf16> to vector<32x128xbf16>
    %cst_164 = arith.constant dense<0.000000e+00> : vector<16x128xf32>
    %254 = tpu.matmul %251, %253, %cst_164 {dimension_numbers = #tpu.dot_dimension_numbers<[1], [0], [0], [1], [0, 0, 1, 1], [], []>} : vector<16x32xbf16>, vector<32x128xbf16>, vector<16x128xf32> -> vector<16x128xf32>
    %c1_165 = arith.constant 1 : index
    %c0_166 = arith.constant 0 : index
    %c0_167 = arith.constant 0 : index
    %255 = vector.load %arg16[%c1_165, %c0_166, %c0_167] : memref<2x1x128xf32, #tpu.memory_space<vmem>>, vector<1x1x128xf32>
    %256 = vector.shape_cast %255 : vector<1x1x128xf32> to vector<1x128xf32>
    %257 = vector.broadcast %256 : vector<1x128xf32> to vector<16x128xf32>
    %258 = arith.addf %254, %257 : vector<16x128xf32>
    %cst_168 = arith.constant 1.702000e+00 : f32
    %259 = vector.broadcast %cst_168 : f32 to vector<16x128xf32>
    %260 = arith.mulf %259, %258 : vector<16x128xf32>
    %261 = arith.negf %260 : vector<16x128xf32>
    %262 = math.exp %261 : vector<16x128xf32>
    %cst_169 = arith.constant 1.000000e+00 : f32
    %263 = vector.broadcast %cst_169 : f32 to vector<16x128xf32>
    %264 = arith.addf %263, %262 : vector<16x128xf32>
    %265 = arith.divf %263, %264 : vector<16x128xf32>
    %266 = arith.mulf %258, %265 : vector<16x128xf32>
    %267 = arith.truncf %266 : vector<16x128xf32> to vector<16x128xbf16>
    %c1_170 = arith.constant 1 : index
    %c0_171 = arith.constant 0 : index
    %c0_172 = arith.constant 0 : index
    %268 = vector.load %arg17[%c1_170, %c0_171, %c0_172] : memref<2x128x32xbf16, #tpu.memory_space<vmem>>, vector<1x128x32xbf16>
    %269 = vector.shape_cast %268 : vector<1x128x32xbf16> to vector<128x32xbf16>
    %cst_173 = arith.constant dense<0.000000e+00> : vector<16x32xf32>
    %270 = tpu.matmul %267, %269, %cst_173 {dimension_numbers = #tpu.dot_dimension_numbers<[1], [0], [0], [1], [0, 0, 1, 1], [], []>} : vector<16x128xbf16>, vector<128x32xbf16>, vector<16x32xf32> -> vector<16x32xf32>
    %c1_174 = arith.constant 1 : index
    %c0_175 = arith.constant 0 : index
    %c0_176 = arith.constant 0 : index
    %271 = vector.load %arg18[%c1_174, %c0_175, %c0_176] : memref<2x1x32xf32, #tpu.memory_space<vmem>>, vector<1x1x32xf32>
    %272 = vector.shape_cast %271 : vector<1x1x32xf32> to vector<1x32xf32>
    %273 = vector.broadcast %272 : vector<1x32xf32> to vector<16x32xf32>
    %274 = arith.addf %270, %273 : vector<16x32xf32>
    %275 = arith.addf %226, %274 : vector<16x32xf32>
    %c0_177 = arith.constant 0 : index
    %c0_178 = arith.constant 0 : index
    %276 = vector.load %arg24[%c0_177, %c0_178] : memref<16x32xf32, #tpu.memory_space<vmem>>, vector<16x32xf32>
    tpu.vector_store %arg24[%c0_177, %c0_178], %275 {strides = array<i32>} : memref<16x32xf32, #tpu.memory_space<vmem>>, vector<16x32xf32>,
    %c0_179 = arith.constant 0 : index
    %277 = memref.load %arg22[%c0_179] : memref<2xi32, #tpu.memory_space<smem>>
    %278 = arith.index_cast %277 : i32 to index
    %c0_180 = arith.constant 0 : index
    %279 = vector.load %arg24[%278, %c0_180] : memref<16x32xf32, #tpu.memory_space<vmem>>, vector<1x32xf32>
    %c1_181 = arith.constant 1 : index
    %280 = memref.load %arg22[%c1_181] : memref<2xi32, #tpu.memory_space<smem>>
    %281 = arith.index_cast %280 : i32 to index
    %c0_182 = arith.constant 0 : index
    %282 = vector.load %arg24[%281, %c0_182] : memref<16x32xf32, #tpu.memory_space<vmem>>, vector<1x32xf32>
    %283 = tpu.concatenate %279, %282 in 0 : vector<1x32xf32>, vector<1x32xf32> -> vector<2x32xf32>
    %c0_183 = arith.constant 0 : index
    %c0_184 = arith.constant 0 : index
    %284 = vector.load %arg19[%c0_183, %c0_184] : memref<1x32xf32, #tpu.memory_space<vmem>>, vector<1x32xf32>
    %c0_185 = arith.constant 0 : index
    %c0_186 = arith.constant 0 : index
    %285 = vector.load %arg20[%c0_185, %c0_186] : memref<1x32xf32, #tpu.memory_space<vmem>>, vector<1x32xf32>
    %cst_187 = arith.constant dense<0.000000e+00> : vector<2xf32>
    %286 = vector.multi_reduction <add>, %283, %cst_187 [1] : vector<2x32xf32> to vector<2xf32>
    %287 = vector.shape_cast %286 : vector<2xf32> to vector<2x1xf32>
    %cst_188 = arith.constant 3.200000e+01 : f32
    %288 = vector.broadcast %cst_188 : f32 to vector<2x1xf32>
    %289 = arith.divf %287, %288 : vector<2x1xf32>
    %290 = vector.broadcast %289 : vector<2x1xf32> to vector<2x32xf32>
    %291 = arith.subf %283, %290 : vector<2x32xf32>
    %292 = arith.mulf %291, %291 : vector<2x32xf32>
    %cst_189 = arith.constant dense<0.000000e+00> : vector<2xf32>
    %293 = vector.multi_reduction <add>, %292, %cst_189 [1] : vector<2x32xf32> to vector<2xf32>
    %294 = vector.shape_cast %293 : vector<2xf32> to vector<2x1xf32>
    %cst_190 = arith.constant 3.200000e+01 : f32
    %295 = vector.broadcast %cst_190 : f32 to vector<2x1xf32>
    %296 = arith.divf %294, %295 : vector<2x1xf32>
    %cst_191 = arith.constant 9.99999974E-6 : f32
    %297 = vector.broadcast %cst_191 : f32 to vector<2x1xf32>
    %298 = arith.addf %296, %297 : vector<2x1xf32>
    %299 = math.rsqrt %298 : vector<2x1xf32>
    %300 = vector.broadcast %299 : vector<2x1xf32> to vector<2x32xf32>
    %301 = arith.mulf %291, %300 : vector<2x32xf32>
    %302 = vector.broadcast %284 : vector<1x32xf32> to vector<2x32xf32>
    %303 = arith.mulf %301, %302 : vector<2x32xf32>
    %304 = vector.broadcast %285 : vector<1x32xf32> to vector<2x32xf32>
    %305 = arith.addf %303, %304 : vector<2x32xf32>
    %306 = arith.truncf %305 : vector<2x32xf32> to vector<2x32xbf16>
    %c0_192 = arith.constant 0 : index
    %c0_193 = arith.constant 0 : index
    %307 = vector.load %arg21[%c0_192, %c0_193] : memref<32x128xbf16, #tpu.memory_space<vmem>>, vector<32x128xbf16>
    %cst_194 = arith.constant dense<0.000000e+00> : vector<2x128xf32>
    %308 = tpu.matmul %306, %307, %cst_194 {dimension_numbers = #tpu.dot_dimension_numbers<[1], [0], [0], [1], [0, 0, 1, 1], [], []>} : vector<2x32xbf16>, vector<32x128xbf16>, vector<2x128xf32> -> vector<2x128xf32>
    %c0_195 = arith.constant 0 : index
    %c0_196 = arith.constant 0 : index
    %309 = vector.load %arg23[%c0_195, %c0_196] : memref<2x128xf32, #tpu.memory_space<vmem>>, vector<2x128xf32>
    tpu.vector_store %arg23[%c0_195, %c0_196], %308 {strides = array<i32>} : memref<2x128xf32, #tpu.memory_space<vmem>>, vector<2x128xf32>,
    return
  }
}

</mosaic_0001>

<bundles_post_ra>
// kernel: text_encoder.1
= control target key start
LH: loop header
LB: loop body
LE: loop exit
PB: predicated region body
PF: predicated region fallthrough
CT: control target
= control target key end

     0   :  { %s3082_s0 = inlined_call_operand.vmem [shape: f32[16,32], index: 0, kind: input, shape index: {}]   ;;  %s3083_s1 = inlined_call_operand.vmem [shape: f32[16,32], index: 1, kind: input, shape index: {}]   ;;  %s3084_s2 = inlined_call_operand.vmem [shape: f32[32,16], index: 2, kind: input, shape index: {}]   ;;  %s3085_s3 = inlined_call_operand.vmem [shape: f32[2,1,32], index: 3, kind: input, shape index: {}]   ;;  %s3086_s4 = inlined_call_operand.vmem [shape: f32[2,1,32], index: 4, kind: input, shape index: {}]   ;;  %s3087_s5 = inlined_call_operand.vmem [shape: bf16[2,2,32,32], index: 5, kind: input, shape index: {}]   ;;  %s3088_s6 = inlined_call_operand.vmem [shape: f32[2,2,1,32], index: 6, kind: input, shape index: {}]   ;;  %s3089_s7 = inlined_call_operand.vmem [shape: bf16[2,32,32], index: 7, kind: input, shape index: {}]   ;;  %s3090_s8 = inlined_call_operand.vmem [shape: f32[2,1,32], index: 8, kind: input, shape index: {}]   ;;  %s3091_s9 = inlined_call_operand.vmem [shape: bf16[2,32,32], index: 9, kind: input, shape index: {}]   ;;  %s3092_s10 = inlined_call_operand.vmem [shape: f32[2,1,32], index: 10, kind: input, shape index: {}]   ;;  %s3093_s11 = inlined_call_operand.vmem [shape: bf16[2,2,32,32], index: 11, kind: input, shape index: {}]   ;;  %s3094_s12 = inlined_call_operand.vmem [shape: f32[2,1,32], index: 12, kind: input, shape index: {}]   ;;  %s3095_s13 = inlined_call_operand.vmem [shape: f32[2,1,32], index: 13, kind: input, shape index: {}]   ;;  %s3096_s14 = inlined_call_operand.vmem [shape: f32[2,1,32], index: 14, kind: input, shape index: {}]   ;;  %s3097_s15 = inlined_call_operand.vmem [shape: bf16[2,32,128], index: 15, kind: input, shape index: {}]   ;;  %s3098_s16 = inlined_call_operand.vmem [shape: f32[2,1,128], index: 16, kind: input, shape index: {}]   ;;  %s3099_s17 = inlined_call_operand.vmem [shape: bf16[2,128,32], index: 17, kind: input, shape index: {}]   ;;  %s3100_s18 = inlined_call_operand.vmem [shape: f32[2,1,32], index: 18, kind: input, shape index: {}]   ;;  %s3101_s19 = inlined_call_operand.vmem [shape: f32[1,32], index: 19, kind: input, shape index: {}]   ;;  %s3102_s20 = inlined_call_operand.vmem [shape: f32[1,32], index: 20, kind: input, shape index: {}]   ;;  %s3103_s21 = inlined_call_operand.vmem [shape: bf16[32,128], index: 21, kind: input, shape index: {}]   ;;  %s3104_s22 = inlined_call_operand.vmem [shape: s32[2], index: 22, kind: input, shape index: {}]   ;;  %s3105_s23 = inlined_call_operand.hbm [shape: f32[2,128], index: 23, kind: output, shape index: {}]  }
   0x1   :  { %3114 = sst [smem:[#allocation9_spill]] %s3082_s0 }
   0x2   :  { %3115 = sst [smem:[#allocation10_spill]] %s3083_s1 }
   0x3   :  { %3116 = sst [smem:[#allocation11_spill]] %s3084_s2 }
   0x4   :  { %3117 = sst [smem:[#allocation12_spill]] %s3085_s3 }
   0x5   :  { %3118 = sst [smem:[#allocation13_spill]] %s3086_s4 }
   0x6   :  { %3119 = sst [smem:[#allocation14_spill]] %s3087_s5 }
   0x7   :  { %3120 = sst [smem:[#allocation15_spill]] %s3088_s6 }
   0x8   :  { %3121 = sst [smem:[#allocation16_spill]] %s3089_s7 }
   0x9   :  { %28 = vsyncpa [#allocation5], 0 }
   0xa   :  { %29 = vsyncpa [#allocation4], 0  ;;  %s80_s24 = sshll.u32 %s3104_s22, 4  ;;  %s81_s24 = int_to_ptr.vmem [resolvable:$true] %s80_s24 }
   0xb   :  { %s2474_s25 = scalar_lea.vmem %s81_s24, 16  ;;  %p2479_p1 = scmp.lt.s32.totalorder %s81_s24, %s81_s24 }
   0xc   :  { %p2475_p0 = scmp.ne.s32.totalorder %s81_s24, %s2474_s25  ;;  %p2480_p2 = scmp.lt.s32.totalorder %s2474_s25, %s2474_s25 }
   0xe   :  { %p2481_p3 = por %p2480_p2, %p2479_p1 }
  0x10   :  { %p2482_p4 = pnand %p2481_p3, %p2475_p0 }
  0x12   :  { %2485 = shalt.err (!%p2482_p4)
}
  0x13   :  { %s2512_s5 = smov [#allocation3]  }
  0x14   :  { %83 = dma.vmem_to_smem %s81_s24, 16, %s2512_s5, [#allocation5]  }
  0x15   :  { %2508 = dma.done.wait [#allocation5], 16  }
  0x16   :  { %2509 = vsyncadd [#allocation5], 4294967280 }
  0x17   :  { %87 = sfence }
  0x18   :  { %s3122_s2 = sld [smem:[#allocation9_spill]]  ;;  %s3123_s22 = sld [smem:[#allocation10_spill]]  ;;  %vm101_vm0 = vcmask 261120   ;;  %v2513_v20 = vmov 0.0   ;;  %vm2514_vm1 = vmmov 0   ;;  %v2368_v42 = vld [vmem:[%s3091_s9] sm:$0xff]  }
  0x19   :  { %s3124_s30 = sld [smem:[#allocation14_spill]]  ;;  %s3125_s5 = sld [smem:[#allocation16_spill]]  ;;  %2172 = vmatprep.subr.bf16.mxu1 %v2513_v20  ;;  %2188 = vmatprep.subr.bf16.mxu0 %v2513_v20  ;;  %v2369_v43 = vld [vmem:[%s3091_s9 + $0x8] sm:$0xff]   ;;  %v1950_v46 = vld [vmem:[%s3090_s8] ss:$0 sm:$0xff]  ;;  %vm468_vm2 = vcmask 130048  }
  0x1a   :  { %2176 = vmatprep.mubr.msk.bf16.mxu1 %vm2514_vm1, %v2513_v20  ;;  %2192 = vmatprep.mubr.msk.bf16.mxu0 %vm2514_vm1, %v2513_v20  ;;  %s3126_s7 = sld [smem:[#allocation12_spill]]  ;;  %s3127_s3 = sld [smem:[#allocation13_spill]]  ;;  %vm1825_vm3 = vcmask 1040384   ;;  %vm1829_vm4 = vcmask 254976  }
  0x1b   :  { %s3128_s28 = sld [smem:[#allocation15_spill]]  ;;  %s3129_s6 = sld [smem:[#allocation11_spill]] }
  0x1c   :  { %s2091_s24 = sld [smem:[#allocation3 + $0x1]] }
  0x1e   :  { %v89_v0 = vld [vmem:[%s3122_s2] sm:$0xff]  ;;  %v90_v2 = vld [vmem:[%s3122_s2 + $0x8] sm:$0xff] }
  0x1f   :  { %v91_v1 = vld [vmem:[%s3123_s22] sm:$0xff]  ;;  %v92_v4 = vld [vmem:[%s3123_s22 + $0x8] sm:$0xff]  ;;  %v2366_v39 = vld [vmem:[%s3124_s30 + $0x10] sm:$0xff]  }
  0x20   :  { %v2648_v3 = vadd.f32 %v91_v1, %v89_v0  ;;  %v2653_v5 = vadd.f32 %v92_v4, %v90_v2  ;;  %v2362_v18 = vld [vmem:[%s3124_s30] sm:$0xff]   ;;  %v2364_v21 = vld [vmem:[%s3124_s30 + $0x8] sm:$0xff]   ;;  %v2367_v41 = vld [vmem:[%s3124_s30 + $0x18] sm:$0xff]  }
  0x21   :  { %v2363_v19 = vld [vmem:[%s3125_s5] sm:$0xff]   ;;  %2173 = vmatpush3.bf16.msra.mxu1 %v2362_v18  ;;  %v2365_v22 = vld [vmem:[%s3125_s5 + $0x8] sm:$0xff]  }
  0x22   :  { %v102_v6 = vsel %vm101_vm0, %v2648_v3, 0.0  ;;  %v105_v7 = vsel %vm101_vm0, %v2653_v5, 0.0  ;;  %2189 = vmatpush3.bf16.msra.mxu0 %v2363_v19  ;;  %2174 = vmatprep.subr.bf16.mxu1 %v2513_v20  ;;  %v1935_v31 = vld [vmem:[%s3126_s7] ss:$0 sm:$0xff]  ;;  %v1946_v61 = vld [vmem:[%s3128_s28 + $0x1] ss:$0 sm:$0xff] }
  0x23   :  { %103 = vadd.xlane.f32.xlu0 %v102_v6  ;;  %2190 = vmatprep.subr.bf16.mxu0 %v2513_v20  ;;  %v1936_v35 = vld [vmem:[%s3127_s3] ss:$0 sm:$0xff]  ;;  %v2746_v19 = vld [vmem:[%s3129_s6 + $0x8] sm:$0xff]  ;;  %s1820_s25 = scalar_lea.vmem [#allocation2], %s2091_s24 }
  0x24   :  { %v1937_v44 = vld [vmem:[%s3128_s28] ss:$0 sm:$0xff] }
  0x25   :  { %2175 = vmatpush3.bf16.msra.mxu1 %v2364_v21 }
  0x26   :  { %2191 = vmatpush3.bf16.msra.mxu0 %v2365_v22  ;;  %2180 = vmatprep.subr.bf16.mxu1 %v2513_v20 }
  0x27   :  { %106 = vadd.xlane.f32.xlu0 %v105_v7  ;;  %v1954_v7 = vld [vmem:[%s3092_s10] ss:$0 sm:$0xff] }
  0xb0   :  { %v104_v8 = vpop.xlane.xlu0 %103 }
  0xb1   :  { %v109_v9 = vmul.f32 0.03125, %v104_v8 }
  0xb3   :  { %v111_v10 = vsub.f32 %v2648_v3, %v109_v9 }
  0xb4   :  { %v107_v11 = vpop.xlane.xlu0 %106 }
  0xb5   :  { %v110_v12 = vmul.f32 0.03125, %v107_v11  ;;  %v113_v13 = vmul.f32 %v111_v10, %v111_v10 }
  0xb7   :  { %v112_v14 = vsub.f32 %v2653_v5, %v110_v12  ;;  %v115_v15 = vsel %vm101_vm0, %v113_v13, 0.0 }
  0xb8   :  { %116 = vadd.xlane.f32.xlu1 %v115_v15  ;;  %v2736_v15 = vld [vmem:[%s3129_s6] sm:$0xff] }
  0xb9   :  { %v114_v16 = vmul.f32 %v112_v14, %v112_v14 }
  0xbb   :  { %v118_v17 = vsel %vm101_vm0, %v114_v16, 0.0 }
  0xbc   :  { %119 = vadd.xlane.f32.xlu1 %v118_v17  ;;  %v2741_v17 = vld [vmem:[%s3129_s6 + $0x10] sm:$0xff] }
 0x145   :  { %v117_v23 = vpop.xlane.xlu1 %116 }
 0x146   :  { %v121_v24 = vmul.f32 0.03125, %v117_v23  ;;  %v2752_v23 = vld [vmem:[%s3129_s6 + $0x18] sm:$0xff] }
 0x148   :  { %v123_v25 = vadd.f32 1e-05, %v121_v24 }
 0x149   :  { %v120_v26 = vpop.xlane.xlu1 %119 }
 0x14a   :  { %2408 = vrsqrt.f32 %v123_v25  ;;  %v122_v27 = vmul.f32 0.03125, %v120_v26 }
 0x14c   :  { %v124_v28 = vadd.f32 1e-05, %v122_v27 }
 0x14e   :  { %2410 = vrsqrt.f32 %v124_v28 }
 0x154   :  { %v2409_v29 = vpop.eup %2408 }
 0x155   :  { %v127_v30 = vmul.f32 %v2409_v29, %v111_v10 }
 0x157   :  { %v135_v34 = vmul.f32 %v1935_v31, %v127_v30 }
 0x158   :  { %v2411_v32 = vpop.eup %2410 }
 0x159   :  { %v128_v33 = vmul.f32 %v2411_v32, %v112_v14  ;;  %v143_v37 = vadd.f32 %v1936_v35, %v135_v34 }
 0x15b   :  { %v136_v36 = vmul.f32 %v1935_v31, %v128_v33 }
 0x15d   :  { %v144_v38 = vadd.f32 %v1936_v35, %v136_v36 }
 0x15f   :  { %v145_v40 = vpack.c.bf16 %v144_v38, %v143_v37 }
 0x161   :  { %2177 = vmatmul.mubr.msk.bf16.vlgmr.msra.gmra.mrb[0].mxu1 %vm101_vm0, %v145_v40  ;;  %2193 = vmatmul.mubr.msk.bf16.vlgmr.msra.gmra.mrb[0].mxu0 %vm101_vm0, %v145_v40 }
 0x162   :  { %2181 = vmatpush3.bf16.msra.mxu1 %v2366_v39  ;;  %2184 = vmatprep.mubr.msk.bf16.mxu1 %vm2514_vm1, %v2513_v20 }
 0x163   :  { %2182 = vmatprep.subr.bf16.mxu1 %v2513_v20 }
 0x166   :  { %2183 = vmatpush3.bf16.msra.mxu1 %v2367_v41 }
 0x167   :  { %2196 = vmatprep.subr.bf16.mxu1 %v2513_v20 }
 0x169   :  { %2185 = vmatmul.mubr.msk.bf16.vlgmr.msra.gmra.mrb[4].mxu1 %vm101_vm0, %v145_v40 }
 0x16a   :  { %2197 = vmatpush3.bf16.msra.mxu1 %v2368_v42  ;;  %2200 = vmatprep.mubr.msk.bf16.mxu1 %vm2514_vm1, %v2513_v20 }
 0x16b   :  { %2198 = vmatprep.subr.bf16.mxu1 %v2513_v20 }
 0x16e   :  { %2199 = vmatpush3.bf16.msra.mxu1 %v2369_v43 }
 0x171   :  { %2201 = vmatmul.mubr.msk.bf16.vlgmr.msra.gmra.mrb[8].mxu1 %vm101_vm0, %v145_v40 }
 0x234   :  { %v206_v45 = vpop.f32.mrb[0].mxu1  ;;  %v336_v47 = vpop.f32.mrb[0].mxu0 }
 0x235   :  { %v2178_v48 = vpop.f32.mrb[1].mxu1  ;;  %v2194_v49 = vpop.f32.mrb[1].mxu0  ;;  %v207_v52 = vadd.f32 %v1937_v44, %v206_v45  ;;  %v337_v53 = vadd.f32 %v1950_v46, %v336_v47 }
 0x236   :  { %v209_v50 = vpop.f32.mrb[2].mxu1  ;;  %v339_v51 = vpop.f32.mrb[2].mxu0 }
 0x237   :  { %v210_v54 = vadd.f32 %v1937_v44, %v209_v50  ;;  %v340_v55 = vadd.f32 %v1950_v46, %v339_v51  ;;  %v2179_v56 = vpop.f32.mrb[3].mxu1  ;;  %v2195_v57 = vpop.f32.mrb[3].mxu0 }
 0x239   :  { %v407_v58 = vpack.c.bf16 %v210_v54, %v207_v52  ;;  %v409_v59 = vpack.c.bf16 %v340_v55, %v337_v53  ;;  %v2371_v52 = vld [vmem:[%s3093_s11] sm:$0xff]  }
 0x23b   :  { %2356 = vmatprep.subr.msk.bf16.mxu0 %vm101_vm0, %v409_v59  ;;  %2206 = vmatprep.mubr.msk.bf16.mxu0 %vm101_vm0, %v407_v58  ;;  %v417_v60 = vsel %vm101_vm0, %v409_v59, 0 }
 0x23c   :  { %v272_v62 = vpop.f32.mrb[4].mxu1  ;;  %2205 = vmatpush3.bf16.xpose.msra.mxu0 %v417_v60 }
 0x23d   :  { %v2186_v63 = vpop.f32.mrb[5].mxu1  ;;  %2216 = vmatprep.subr.bf16.mxu0 %v2513_v20  ;;  %v273_v1 = vadd.f32 %v1946_v61, %v272_v62 }
 0x23e   :  { %v275_v0 = vpop.f32.mrb[6].mxu1 }
 0x23f   :  { %v276_v2 = vadd.f32 %v1946_v61, %v275_v0  ;;  %v2187_v4 = vpop.f32.mrb[7].mxu1 }
 0x241   :  { %v408_v6 = vpack.c.bf16 %v276_v2, %v273_v1  ;;  %v2370_v2 = vld [vmem:[%s3093_s11 + $0x10] sm:$0xff]  }
 0x243   :  { %2207 = vmatmul.mubr.msk.bf16.vlgmr.msra.gmra.mrb[4].mxu0 %vm101_vm0, %v408_v6  ;;  %v2372_v6 = vld [vmem:[%s3093_s11 + $0x18] sm:$0xff]  }
 0x244   :  { %v400_v8 = vpop.f32.mrb[8].mxu1  ;;  %2220 = vmatprep.mubr.msk.bf16.mxu0 %vm2514_vm1, %v2513_v20  ;;  %2217 = vmatpush3.bf16.msra.mxu0 %v2371_v52 }
 0x245   :  { %v2202_v9 = vpop.f32.mrb[9].mxu1  ;;  %v401_v11 = vadd.f32 %v1954_v7, %v400_v8  ;;  %2218 = vmatprep.subr.bf16.mxu0 %v2513_v20 }
 0x246   :  { %v403_v10 = vpop.f32.mrb[10].mxu1 }
 0x247   :  { %v404_v12 = vadd.f32 %v1954_v7, %v403_v10  ;;  %v2203_v13 = vpop.f32.mrb[11].mxu1  ;;  %v2373_v7 = vld [vmem:[%s3093_s11 + $0x8] sm:$0xff]  }
 0x248   :  { %2219 = vmatpush3.bf16.msra.mxu0 %v2373_v7  ;;  %v2382_v7 = vld [vmem:[%s3099_s17 + $0x30] sm:$0xff]  }
 0x249   :  { %v515_v14 = vpack.c.bf16 %v404_v12, %v401_v11  ;;  %2232 = vmatprep.subr.bf16.mxu0 %v2513_v20 }
 0x24b   :  { %2210 = vmatprep.subr.bf16.mxu1 %v515_v14 }
 0x24c   :  { %2211 = vmatpush3.bf16.msra.mxu1 %v515_v14  ;;  %v1965_v14 = vld [vmem:[%s3094_s12] ss:$0 sm:$0xff] }
 0x24d   :  { %2224 = vmatprep.subr.bf16.mxu1 %v2513_v20 }
 0x316   :  { %v2208_v16 = vpop.f32.mrb[4].mxu0 }
 0x317   :  { %v453_v18 = vpop.f32.mrb[5].mxu0  ;;  %v462_v25 = vadd.f32 %v2208_v16, %v2741_v17 }
 0x318   :  { %v454_v21 = vadd.f32 %v453_v18, %v2736_v15  ;;  %v2209_v22 = vpop.f32.mrb[6].mxu0 }
 0x319   :  { %v456_v24 = vpop.f32.mrb[7].mxu0  ;;  %v465_v28 = vadd.f32 %v2209_v22, %v2752_v23  ;;  %v475_v30 = vsel %vm468_vm2, %v462_v25, -inf }
 0x31a   :  { %v457_v26 = vadd.f32 %v456_v24, %v2746_v19  ;;  %v469_v27 = vsel %vm468_vm2, %v454_v21, -inf }
 0x31b   :  { %470 = vmax.xlane.f32.xlu0 %v469_v27  ;;  %v478_v31 = vsel %vm468_vm2, %v465_v28, -inf }
 0x31c   :  { %v472_v29 = vsel %vm468_vm2, %v457_v26, -inf }
 0x31d   :  { %473 = vmax.xlane.f32.xlu1 %v472_v29 }
 0x31f   :  { %476 = vmax.xlane.f32.xlu0 %v475_v30 }
 0x321   :  { %479 = vmax.xlane.f32.xlu1 %v478_v31 }
 0x3a8   :  { %v471_v32 = vpop.xlane.xlu0 %470 }
 0x3a9   :  { %v481_v33 = vsub.f32 %v454_v21, %v471_v32 }
 0x3aa   :  { %v474_v34 = vpop.xlane.xlu1 %473 }
 0x3ab   :  { %v485_v35 = vmul.f32 1.442695, %v481_v33  ;;  %v482_v36 = vsub.f32 %v457_v26, %v474_v34 }
 0x3ac   :  { %v477_v37 = vpop.xlane.xlu0 %476 }
 0x3ad   :  { %2412 = vpow2.f32 %v485_v35  ;;  %v487_v38 = vmul.f32 1.442695, %v482_v36  ;;  %v483_v39 = vsub.f32 %v462_v25, %v477_v37 }
 0x3ae   :  { %v480_v40 = vpop.xlane.xlu1 %479 }
 0x3af   :  { %2414 = vpow2.f32 %v487_v38  ;;  %v489_v41 = vmul.f32 1.442695, %v483_v39  ;;  %v484_v42 = vsub.f32 %v465_v28, %v480_v40 }
 0x3b1   :  { %2416 = vpow2.f32 %v489_v41  ;;  %v491_v43 = vmul.f32 1.442695, %v484_v42 }
 0x3b3   :  { %2418 = vpow2.f32 %v491_v43 }
 0x3b7   :  { %v2413_v44 = vpop.eup %2412 }
 0x3b8   :  { %v493_v45 = vsel %vm468_vm2, %v2413_v44, 0.0 }
 0x3b9   :  { %v2415_v46 = vpop.eup %2414  ;;  %494 = vadd.xlane.f32.xlu0 %v493_v45  ;;  %v2375_v45 = vld [vmem:[%s3097_s15 + $0x8] sm:$0xff]  }
 0x3ba   :  { %v496_v47 = vsel %vm468_vm2, %v2415_v46, 0.0 }
 0x3bb   :  { %v2417_v48 = vpop.eup %2416  ;;  %497 = vadd.xlane.f32.xlu1 %v496_v47 }
 0x3bc   :  { %v499_v49 = vsel %vm468_vm2, %v2417_v48, 0.0 }
 0x3bd   :  { %v2419_v50 = vpop.eup %2418  ;;  %500 = vadd.xlane.f32.xlu0 %v499_v49 }
 0x3be   :  { %v502_v51 = vsel %vm468_vm2, %v2419_v50, 0.0 }
 0x3bf   :  { %503 = vadd.xlane.f32.xlu1 %v502_v51 }
 0x446   :  { %v495_v53 = vpop.xlane.xlu0 %494 }
 0x447   :  { %2420 = vrcp.f32 %v495_v53  ;;  %v1973_v53 = vld [vmem:[%s3095_s13] ss:$0 sm:$0xff] }
 0x448   :  { %v498_v54 = vpop.xlane.xlu1 %497 }
 0x449   :  { %2422 = vrcp.f32 %v498_v54 }
 0x44a   :  { %v501_v55 = vpop.xlane.xlu0 %500 }
 0x44b   :  { %2424 = vrcp.f32 %v501_v55 }
 0x44c   :  { %v504_v56 = vpop.xlane.xlu1 %503 }
 0x44d   :  { %2426 = vrcp.f32 %v504_v56 }
 0x451   :  { %v2421_v57 = vpop.eup %2420 }
 0x452   :  { %v509_v59 = vmul.f32 %v2421_v57, %v2413_v44  ;;  %v2374_v44 = vld [vmem:[%s3097_s15] sm:$0xff]  }
 0x453   :  { %v2423_v58 = vpop.eup %2422 }
 0x454   :  { %v510_v60 = vmul.f32 %v2423_v58, %v2415_v46  ;;  %v1974_v58 = vld [vmem:[%s3096_s14] ss:$0 sm:$0xff] }
 0x455   :  { %v2425_v61 = vpop.eup %2424 }
 0x456   :  { %v513_v62 = vpack.c.bf16 %v510_v60, %v509_v59  ;;  %v511_v0 = vmul.f32 %v2425_v61, %v2417_v48 }
 0x457   :  { %v2427_v63 = vpop.eup %2426 }
 0x458   :  { %v512_v1 = vmul.f32 %v2427_v63, %v2419_v50  ;;  %2212 = vmatprep.mubr.msk.bf16.mxu1 %vm468_vm2, %v513_v62  ;;  %v2376_v63 = vld [vmem:[%s3099_s17] sm:$0xff]  }
 0x45a   :  { %v514_v4 = vpack.c.bf16 %v512_v1, %v511_v0  ;;  %v2377_v0 = vld [vmem:[%s3099_s17 + $0x8] sm:$0xff]   ;;  %v2378_v1 = vld [vmem:[%s3099_s17 + $0x10] sm:$0xff]  }
 0x45c   :  { %2213 = vmatmul.mubr.msk.bf16.vlgmr.msra.gmra.mrb[12].mxu1 %vm468_vm2, %v514_v4  ;;  %v2380_v4 = vld [vmem:[%s3099_s17 + $0x20] sm:$0xff]  }
 0x45d   :  { %2225 = vmatpush3.bf16.msra.mxu1 %v2370_v2  ;;  %2228 = vmatprep.mubr.msk.bf16.mxu1 %vm2514_vm1, %v2513_v20  ;;  %v2379_v2 = vld [vmem:[%s3099_s17 + $0x18] sm:$0xff]  }
 0x45e   :  { %2226 = vmatprep.subr.bf16.mxu1 %v2513_v20 }
 0x461   :  { %2227 = vmatpush3.bf16.msra.mxu1 %v2372_v6  ;;  %v2381_v6 = vld [vmem:[%s3099_s17 + $0x28] sm:$0xff]  }
 0x462   :  { %2240 = vmatprep.subr.bf16.mxu1 %v2513_v20 }
 0x52f   :  { %v2214_v8 = vpop.f32.mrb[12].mxu1 }
 0x530   :  { %v556_v9 = vpop.f32.mrb[13].mxu1 }
 0x531   :  { %v2215_v10 = vpop.f32.mrb[14].mxu1 }
 0x532   :  { %v641_v11 = vpack.c.bf16 %v2215_v10, %v2214_v8  ;;  %v559_v12 = vpop.f32.mrb[15].mxu1  ;;  %v2383_v8 = vld [vmem:[%s3099_s17 + $0x38] sm:$0xff]  }
 0x533   :  { %v572_v13 = vpack.c.bf16 %v559_v12, %v556_v9  ;;  %v1975_v9 = vld [vmem:[%s3098_s16] ss:$0 sm:$0xff] }
 0x534   :  { %2229 = vmatmul.mubr.msk.bf16.vlgmr.msra.gmra.mrb[16].mxu1 %vm101_vm0, %v641_v11 }
 0x535   :  { %2221 = vmatmul.mubr.msk.bf16.vlgmr.msra.gmra.mrb[8].mxu0 %vm101_vm0, %v572_v13  ;;  %2256 = vmatprep.mubr.msk.bf16.mxu1 %vm2514_vm1, %v2513_v20 }
 0x536   :  { %2236 = vmatprep.mubr.msk.bf16.mxu0 %vm2514_vm1, %v2513_v20  ;;  %2233 = vmatpush3.bf16.msra.mxu0 %v2374_v44 }
 0x537   :  { %2234 = vmatprep.subr.bf16.mxu0 %v2513_v20  ;;  %2241 = vmatpush3.bf16.msra.mxu1 %v2376_v63 }
 0x538   :  { %2242 = vmatprep.subr.bf16.mxu1 %v2513_v20 }
 0x53a   :  { %2235 = vmatpush3.bf16.msra.mxu0 %v2375_v45 }
 0x53b   :  { %2260 = vmatprep.subr.bf16.mxu0 %v2513_v20  ;;  %2243 = vmatpush3.bf16.msra.mxu1 %v2377_v0 }
 0x53c   :  { %2244 = vmatprep.subr.bf16.mxu1 %v2513_v20 }
 0x53f   :  { %2245 = vmatpush3.bf16.msra.mxu1 %v2378_v1 }
 0x540   :  { %2246 = vmatprep.subr.bf16.mxu1 %v2513_v20 }
 0x543   :  { %2247 = vmatpush3.bf16.msra.mxu1 %v2379_v2 }
 0x544   :  { %2248 = vmatprep.subr.bf16.mxu1 %v2513_v20 }
 0x547   :  { %2249 = vmatpush3.bf16.msra.mxu1 %v2380_v4  ;;  %v1993_v4 = vld [vmem:[%s3127_s3 + $0x1] ss:$0 sm:$0xff] }
 0x548   :  { %2250 = vmatprep.subr.bf16.mxu1 %v2513_v20 }
 0x54b   :  { %2251 = vmatpush3.bf16.msra.mxu1 %v2381_v6 }
 0x54c   :  { %2252 = vmatprep.subr.bf16.mxu1 %v2513_v20 }
 0x54f   :  { %2253 = vmatpush3.bf16.msra.mxu1 %v2382_v7 }
 0x550   :  { %2254 = vmatprep.subr.bf16.mxu1 %v2513_v20 }
 0x553   :  { %2255 = vmatpush3.bf16.msra.mxu1 %v2383_v8 }
 0x607   :  { %v696_v16 = vpop.f32.mrb[16].mxu1 }
 0x608   :  { %v626_v18 = vpop.f32.mrb[8].mxu0  ;;  %v2230_v21 = vpop.f32.mrb[17].mxu1 }
 0x609   :  { %v639_v22 = vadd.f32 %v1965_v14, %v626_v18  ;;  %v2222_v24 = vpop.f32.mrb[9].mxu0  ;;  %v699_v25 = vpop.f32.mrb[18].mxu1 }
 0x60a   :  { %v629_v26 = vpop.f32.mrb[10].mxu0  ;;  %v2231_v27 = vpop.f32.mrb[19].mxu1 }
 0x60b   :  { %v703_v28 = vadd.f32 %v696_v16, %v639_v22  ;;  %v640_v29 = vadd.f32 %v1965_v14, %v629_v26  ;;  %v2223_v30 = vpop.f32.mrb[11].mxu0 }
 0x60d   :  { %v2795_v31 = vadd.f32 %v703_v28, %v2648_v3  ;;  %v704_v32 = vadd.f32 %v699_v25, %v640_v29 }
 0x60f   :  { %v2798_v33 = vadd.f32 %v704_v32, %v2653_v5  ;;  %v709_v34 = vsel %vm101_vm0, %v2795_v31, 0.0 }
 0x610   :  { %710 = vadd.xlane.f32.xlu0 %v709_v34 }
 0x611   :  { %v712_v35 = vsel %vm101_vm0, %v2798_v33, 0.0 }
 0x612   :  { %713 = vadd.xlane.f32.xlu1 %v712_v35 }
 0x69d   :  { %v711_v36 = vpop.xlane.xlu0 %710 }
 0x69e   :  { %v715_v37 = vmul.f32 0.03125, %v711_v36  ;;  %v1981_v36 = vld [vmem:[%s3100_s18] ss:$0 sm:$0xff] }
 0x69f   :  { %v714_v38 = vpop.xlane.xlu1 %713 }
 0x6a0   :  { %v717_v39 = vsub.f32 %v2795_v31, %v715_v37  ;;  %v716_v40 = vmul.f32 0.03125, %v714_v38 }
 0x6a2   :  { %v718_v3 = vsub.f32 %v2798_v33, %v716_v40  ;;  %v719_v41 = vmul.f32 %v717_v39, %v717_v39 }
 0x6a4   :  { %v721_v5 = vsel %vm101_vm0, %v719_v41, 0.0  ;;  %v720_v42 = vmul.f32 %v718_v3, %v718_v3 }
 0x6a5   :  { %722 = vadd.xlane.f32.xlu0 %v721_v5 }
 0x6a6   :  { %v724_v43 = vsel %vm101_vm0, %v720_v42, 0.0 }
 0x6a7   :  { %725 = vadd.xlane.f32.xlu1 %v724_v43 }
 0x732   :  { %v723_v46 = vpop.xlane.xlu0 %722 }
 0x733   :  { %v727_v47 = vmul.f32 0.03125, %v723_v46 }
 0x734   :  { %v726_v48 = vpop.xlane.xlu1 %725 }
 0x735   :  { %v729_v49 = vadd.f32 1e-05, %v727_v47  ;;  %v728_v50 = vmul.f32 0.03125, %v726_v48 }
 0x737   :  { %2428 = vrsqrt.f32 %v729_v49  ;;  %v730_v51 = vadd.f32 1e-05, %v728_v50 }
 0x739   :  { %2430 = vrsqrt.f32 %v730_v51 }
 0x741   :  { %v2429_v52 = vpop.eup %2428 }
 0x742   :  { %v733_v54 = vmul.f32 %v2429_v52, %v717_v39 }
 0x743   :  { %v2431_v55 = vpop.eup %2430 }
 0x744   :  { %v741_v56 = vmul.f32 %v1973_v53, %v733_v54  ;;  %v734_v57 = vmul.f32 %v2431_v55, %v718_v3  ;;  %v2385_v54 = vld [vmem:[%s3124_s30 + $0x28] sm:$0xff]  }
 0x746   :  { %v742_v59 = vmul.f32 %v1973_v53, %v734_v57  ;;  %v749_v60 = vadd.f32 %v1974_v58, %v741_v56  ;;  %v2384_v53 = vld [vmem:[%s3124_s30 + $0x20] sm:$0xff]  }
 0x748   :  { %v750_v61 = vadd.f32 %v1974_v58, %v742_v59 }
 0x74a   :  { %v751_v62 = vpack.c.bf16 %v750_v61, %v749_v60 }
 0x74c   :  { %2237 = vmatmul.mubr.msk.bf16.vlgmr.msra.gmra.mrb[12].mxu0 %vm101_vm0, %v751_v62  ;;  %v1992_v62 = vld [vmem:[%s3126_s7 + $0x1] ss:$0 sm:$0xff] }
 0x74d   :  { %2264 = vmatprep.mubr.msk.bf16.mxu0 %vm2514_vm1, %v2513_v20  ;;  %2261 = vmatpush3.bf16.msra.mxu0 %v2384_v53 }
 0x74e   :  { %2262 = vmatprep.subr.bf16.mxu0 %v2513_v20 }
 0x751   :  { %2263 = vmatpush3.bf16.msra.mxu0 %v2385_v54 }
 0x752   :  { %2268 = vmatprep.subr.bf16.mxu0 %v2513_v20 }
 0x81f   :  { %v812_v10 = vpop.f32.mrb[12].mxu0 }
 0x820   :  { %v813_v11 = vadd.f32 %v1975_v9, %v812_v10  ;;  %v2238_v12 = vpop.f32.mrb[13].mxu0 }
 0x821   :  { %v815_v13 = vpop.f32.mrb[14].mxu0  ;;  %v2388_v12 = vld [vmem:[%s3125_s5 + $0x10] sm:$0xff]  }
 0x822   :  { %v1979_v14 = vmul.f32 -1.702, %v813_v11  ;;  %v816_v16 = vadd.f32 %v1975_v9, %v815_v13  ;;  %v2239_v18 = vpop.f32.mrb[15].mxu0  ;;  %v2386_v9 = vld [vmem:[%s3124_s30 + $0x30] sm:$0xff]   ;;  %v2389_v13 = vld [vmem:[%s3125_s5 + $0x18] sm:$0xff]   ;;  %s1816_s5 = sld [smem:[#allocation3]] }
 0x823   :  { %v1999_v18 = vld [vmem:[%s3128_s28 + $0x2] ss:$0 sm:$0xff] }
 0x824   :  { %v823_v21 = vmul.f32 1.442695, %v1979_v14  ;;  %v1980_v22 = vmul.f32 -1.702, %v816_v16  ;;  %v2390_v14 = vld [vmem:[%s3091_s9 + $0x10] sm:$0xff]  }
 0x826   :  { %2432 = vpow2.f32 %v823_v21  ;;  %v825_v24 = vmul.f32 1.442695, %v1980_v22 }
 0x828   :  { %2434 = vpow2.f32 %v825_v24 }
 0x830   :  { %v2433_v25 = vpop.eup %2432 }
 0x831   :  { %v827_v26 = vadd.f32 1.0, %v2433_v25 }
 0x832   :  { %v2435_v27 = vpop.eup %2434 }
 0x833   :  { %2436 = vrcp.f32 %v827_v26  ;;  %v828_v28 = vadd.f32 1.0, %v2435_v27 }
 0x835   :  { %2438 = vrcp.f32 %v828_v28 }
 0x83d   :  { %v2437_v29 = vpop.eup %2436 }
 0x83e   :  { %v833_v32 = vmul.f32 %v2437_v29, %v813_v11  ;;  %v2387_v11 = vld [vmem:[%s3124_s30 + $0x38] sm:$0xff]   ;;  %v2008_v29 = vld [vmem:[%s3128_s28 + $0x3] ss:$0 sm:$0xff] }
 0x83f   :  { %v2439_v30 = vpop.eup %2438 }
 0x840   :  { %v834_v34 = vmul.f32 %v2439_v30, %v816_v16  ;;  %v2391_v16 = vld [vmem:[%s3091_s9 + $0x18] sm:$0xff]  }
 0x842   :  { %v835_v35 = vpack.c.bf16 %v834_v34, %v833_v32 }
 0x844   :  { %2257 = vmatmul.mubr.bf16.vlgmr.msra.gmra.mrb[20].mxu1 %v835_v35 }
 0x917   :  { %v941_v37 = vpop.f32.mrb[20].mxu1 }
 0x918   :  { %v942_v38 = vadd.f32 %v1981_v36, %v941_v37  ;;  %v2258_v39 = vpop.f32.mrb[21].mxu1 }
 0x919   :  { %v944_v40 = vpop.f32.mrb[22].mxu1  ;;  %v2017_v39 = vld [vmem:[%s3090_s8 + $0x1] ss:$0 sm:$0xff] }
 0x91a   :  { %v2863_v3 = vadd.f32 %v942_v38, %v2795_v31  ;;  %v945_v41 = vadd.f32 %v1981_v36, %v944_v40  ;;  %v2259_v5 = vpop.f32.mrb[23].mxu1 }
 0x91c   :  { %v2866_v42 = vadd.f32 %v945_v41, %v2798_v33  ;;  %v954_v43 = vsel %vm101_vm0, %v2863_v3, 0.0 }
 0x91d   :  { %955 = vadd.xlane.f32.xlu0 %v954_v43 }
 0x91e   :  { %v957_v44 = vsel %vm101_vm0, %v2866_v42, 0.0 }
 0x91f   :  { %958 = vadd.xlane.f32.xlu1 %v957_v44 }
 0x9aa   :  { %v956_v45 = vpop.xlane.xlu0 %955 }
 0x9ab   :  { %v960_v46 = vmul.f32 0.03125, %v956_v45 }
 0x9ac   :  { %v959_v47 = vpop.xlane.xlu1 %958 }
 0x9ad   :  { %v962_v48 = vsub.f32 %v2863_v3, %v960_v46  ;;  %v961_v31 = vmul.f32 0.03125, %v959_v47 }
 0x9af   :  { %v963_v49 = vsub.f32 %v2866_v42, %v961_v31  ;;  %v964_v50 = vmul.f32 %v962_v48, %v962_v48 }
 0x9b1   :  { %v966_v33 = vsel %vm101_vm0, %v964_v50, 0.0  ;;  %v965_v51 = vmul.f32 %v963_v49, %v963_v49 }
 0x9b2   :  { %967 = vadd.xlane.f32.xlu0 %v966_v33 }
 0x9b3   :  { %v969_v52 = vsel %vm101_vm0, %v965_v51, 0.0 }
 0x9b4   :  { %970 = vadd.xlane.f32.xlu1 %v969_v52 }
 0xa3f   :  { %v968_v55 = vpop.xlane.xlu0 %967 }
 0xa40   :  { %v972_v56 = vmul.f32 0.03125, %v968_v55 }
 0xa41   :  { %v971_v57 = vpop.xlane.xlu1 %970 }
 0xa42   :  { %v974_v58 = vadd.f32 1e-05, %v972_v56  ;;  %v973_v59 = vmul.f32 0.03125, %v971_v57 }
 0xa44   :  { %2440 = vrsqrt.f32 %v974_v58  ;;  %v975_v60 = vadd.f32 1e-05, %v973_v59 }
 0xa46   :  { %2442 = vrsqrt.f32 %v975_v60 }
 0xa4e   :  { %v2441_v61 = vpop.eup %2440 }
 0xa4f   :  { %v978_v63 = vmul.f32 %v2441_v61, %v962_v48  ;;  %v2026_v48 = vld [vmem:[%s3092_s10 + $0x1] ss:$0 sm:$0xff] }
 0xa50   :  { %v2443_v0 = vpop.eup %2442 }
 0xa51   :  { %v986_v1 = vmul.f32 %v1992_v62, %v978_v63  ;;  %v979_v2 = vmul.f32 %v2443_v0, %v963_v49 }
 0xa53   :  { %v987_v6 = vmul.f32 %v1992_v62, %v979_v2  ;;  %v994_v7 = vadd.f32 %v1993_v4, %v986_v1 }
 0xa55   :  { %v995_v8 = vadd.f32 %v1993_v4, %v987_v6 }
 0xa57   :  { %v996_v10 = vpack.c.bf16 %v995_v8, %v994_v7 }
 0xa59   :  { %2265 = vmatmul.mubr.msk.bf16.vlgmr.msra.gmra.mrb[16].mxu0 %vm101_vm0, %v996_v10 }
 0xa5a   :  { %2269 = vmatpush3.bf16.msra.mxu0 %v2386_v9  ;;  %2272 = vmatprep.mubr.msk.bf16.mxu0 %vm2514_vm1, %v2513_v20 }
 0xa5b   :  { %2270 = vmatprep.subr.bf16.mxu0 %v2513_v20 }
 0xa5e   :  { %2271 = vmatpush3.bf16.msra.mxu0 %v2387_v11 }
 0xa5f   :  { %2276 = vmatprep.subr.bf16.mxu0 %v2513_v20 }
 0xa61   :  { %2273 = vmatmul.mubr.msk.bf16.vlgmr.msra.gmra.mrb[20].mxu0 %vm101_vm0, %v996_v10 }
 0xa62   :  { %2277 = vmatpush3.bf16.msra.mxu0 %v2388_v12  ;;  %2280 = vmatprep.mubr.msk.bf16.mxu0 %vm2514_vm1, %v2513_v20 }
 0xa63   :  { %2278 = vmatprep.subr.bf16.mxu0 %v2513_v20 }
 0xa66   :  { %2279 = vmatpush3.bf16.msra.mxu0 %v2389_v13 }
 0xa67   :  { %2284 = vmatprep.subr.bf16.mxu0 %v2513_v20 }
 0xa69   :  { %2281 = vmatmul.mubr.msk.bf16.vlgmr.msra.gmra.mrb[24].mxu0 %vm101_vm0, %v996_v10 }
 0xa6a   :  { %2285 = vmatpush3.bf16.msra.mxu0 %v2390_v14  ;;  %2288 = vmatprep.mubr.msk.bf16.mxu0 %vm2514_vm1, %v2513_v20 }
 0xa6b   :  { %2286 = vmatprep.subr.bf16.mxu0 %v2513_v20 }
 0xa6e   :  { %2287 = vmatpush3.bf16.msra.mxu0 %v2391_v16 }
 0xa71   :  { %2289 = vmatmul.mubr.msk.bf16.vlgmr.msra.gmra.mrb[28].mxu0 %vm101_vm0, %v996_v10 }
 0xb2c   :  { %v1059_v21 = vpop.f32.mrb[16].mxu0 }
 0xb2d   :  { %v2266_v22 = vpop.f32.mrb[17].mxu0  ;;  %v1060_v25 = vadd.f32 %v1999_v18, %v1059_v21 }
 0xb2e   :  { %v1062_v24 = vpop.f32.mrb[18].mxu0 }
 0xb2f   :  { %v1063_v26 = vadd.f32 %v1999_v18, %v1062_v24  ;;  %v2267_v27 = vpop.f32.mrb[19].mxu0 }
 0xb31   :  { %v1264_v28 = vpack.c.bf16 %v1063_v26, %v1060_v25  ;;  %v2393_v25 = vld [vmem:[%s3093_s11 + $0x20] sm:$0xff]  }
 0xb33   :  { %2294 = vmatprep.mubr.msk.bf16.mxu1 %vm101_vm0, %v1264_v28 }
 0xb34   :  { %v1125_v30 = vpop.f32.mrb[20].mxu0 }
 0xb35   :  { %v2274_v32 = vpop.f32.mrb[21].mxu0  ;;  %v1126_v35 = vadd.f32 %v2008_v29, %v1125_v30 }
 0xb36   :  { %v1128_v34 = vpop.f32.mrb[22].mxu0 }
 0xb37   :  { %v1129_v36 = vadd.f32 %v2008_v29, %v1128_v34  ;;  %v2275_v37 = vpop.f32.mrb[23].mxu0 }
 0xb39   :  { %v1265_v38 = vpack.c.bf16 %v1129_v36, %v1126_v35 }
 0xb3c   :  { %v1191_v40 = vpop.f32.mrb[24].mxu0 }
 0xb3d   :  { %v2282_v41 = vpop.f32.mrb[25].mxu0  ;;  %v1192_v43 = vadd.f32 %v2017_v39, %v1191_v40 }
 0xb3e   :  { %v1194_v5 = vpop.f32.mrb[26].mxu0  ;;  %v2392_v41 = vld [vmem:[%s3093_s11 + $0x30] sm:$0xff]  }
 0xb3f   :  { %v1195_v44 = vadd.f32 %v2017_v39, %v1194_v5  ;;  %v2283_v45 = vpop.f32.mrb[27].mxu0 }
 0xb41   :  { %v1266_v46 = vpack.c.bf16 %v1195_v44, %v1192_v43  ;;  %v2394_v43 = vld [vmem:[%s3093_s11 + $0x38] sm:$0xff]   ;;  %v2395_v44 = vld [vmem:[%s3093_s11 + $0x28] sm:$0xff]  }
 0xb43   :  { %2357 = vmatprep.subr.msk.bf16.mxu1 %vm101_vm0, %v1266_v46  ;;  %v1274_v47 = vsel %vm101_vm0, %v1266_v46, 0 }
 0xb44   :  { %v1257_v31 = vpop.f32.mrb[28].mxu0  ;;  %2293 = vmatpush3.bf16.xpose.msra.mxu1 %v1274_v47 }
 0xb45   :  { %v2290_v49 = vpop.f32.mrb[29].mxu0  ;;  %2304 = vmatprep.subr.bf16.mxu1 %v2513_v20  ;;  %v1258_v33 = vadd.f32 %v2026_v48, %v1257_v31 }
 0xb46   :  { %v1260_v50 = vpop.f32.mrb[30].mxu0 }
 0xb47   :  { %v1261_v51 = vadd.f32 %v2026_v48, %v1260_v50  ;;  %v2291_v52 = vpop.f32.mrb[31].mxu0  ;;  %v2042_v50 = vld [vmem:[%s3094_s12 + $0x1] ss:$0 sm:$0xff] }
 0xb49   :  { %v1371_v53 = vpack.c.bf16 %v1261_v51, %v1258_v33 }
 0xb4b   :  { %2295 = vmatmul.mubr.msk.bf16.vlgmr.msra.gmra.mrb[24].mxu1 %vm101_vm0, %v1265_v38  ;;  %2298 = vmatprep.subr.bf16.mxu0 %v1371_v53 }
 0xb4c   :  { %2299 = vmatpush3.bf16.msra.mxu0 %v1371_v53  ;;  %2308 = vmatprep.mubr.msk.bf16.mxu1 %vm2514_vm1, %v2513_v20 }
 0xb4d   :  { %2312 = vmatprep.subr.bf16.mxu0 %v2513_v20  ;;  %2305 = vmatpush3.bf16.msra.mxu1 %v2393_v25 }
 0xb4e   :  { %2306 = vmatprep.subr.bf16.mxu1 %v2513_v20 }
 0xb51   :  { %2307 = vmatpush3.bf16.msra.mxu1 %v2395_v44 }
 0xb52   :  { %2320 = vmatprep.subr.bf16.mxu1 %v2513_v20 }
 0xc1e   :  { %v2296_v54 = vpop.f32.mrb[24].mxu1 }
 0xc1f   :  { %v1310_v55 = vpop.f32.mrb[25].mxu1  ;;  %v1319_v59 = vadd.f32 %v2296_v54, %v2741_v17 }
 0xc20   :  { %v1311_v56 = vadd.f32 %v1310_v55, %v2736_v15  ;;  %v2297_v57 = vpop.f32.mrb[26].mxu1 }
 0xc21   :  { %v1313_v58 = vpop.f32.mrb[27].mxu1  ;;  %v1322_v62 = vadd.f32 %v2297_v57, %v2752_v23  ;;  %v1331_v0 = vsel %vm468_vm2, %v1319_v59, -inf }
 0xc22   :  { %v1314_v60 = vadd.f32 %v1313_v58, %v2746_v19  ;;  %v1325_v61 = vsel %vm468_vm2, %v1311_v56, -inf }
 0xc23   :  { %1326 = vmax.xlane.f32.xlu0 %v1325_v61  ;;  %v1334_v1 = vsel %vm468_vm2, %v1322_v62, -inf }
 0xc24   :  { %v1328_v63 = vsel %vm468_vm2, %v1314_v60, -inf }
 0xc25   :  { %1329 = vmax.xlane.f32.xlu1 %v1328_v63 }
 0xc27   :  { %1332 = vmax.xlane.f32.xlu0 %v1331_v0 }
 0xc29   :  { %1335 = vmax.xlane.f32.xlu1 %v1334_v1 }
 0xcb0   :  { %v1327_v15 = vpop.xlane.xlu0 %1326 }
 0xcb1   :  { %v1337_v2 = vsub.f32 %v1311_v56, %v1327_v15 }
 0xcb2   :  { %v1330_v4 = vpop.xlane.xlu1 %1329 }
 0xcb3   :  { %v1341_v17 = vmul.f32 1.442695, %v1337_v2  ;;  %v1338_v6 = vsub.f32 %v1314_v60, %v1330_v4 }
 0xcb4   :  { %v1333_v19 = vpop.xlane.xlu0 %1332 }
 0xcb5   :  { %2444 = vpow2.f32 %v1341_v17  ;;  %v1343_v7 = vmul.f32 1.442695, %v1338_v6  ;;  %v1339_v8 = vsub.f32 %v1319_v59, %v1333_v19 }
 0xcb6   :  { %v1336_v9 = vpop.xlane.xlu1 %1335 }
 0xcb7   :  { %2446 = vpow2.f32 %v1343_v7  ;;  %v1345_v23 = vmul.f32 1.442695, %v1339_v8  ;;  %v1340_v10 = vsub.f32 %v1322_v62, %v1336_v9  ;;  %v2396_v9 = vld [vmem:[%s3097_s15 + $0x10] sm:$0xff]  }
 0xcb9   :  { %2448 = vpow2.f32 %v1345_v23  ;;  %v1347_v11 = vmul.f32 1.442695, %v1340_v10  ;;  %v2397_v23 = vld [vmem:[%s3097_s15 + $0x18] sm:$0xff]  }
 0xcbb   :  { %2450 = vpow2.f32 %v1347_v11 }
 0xcbf   :  { %v2445_v12 = vpop.eup %2444 }
 0xcc0   :  { %v1349_v13 = vsel %vm468_vm2, %v2445_v12, 0.0 }
 0xcc1   :  { %v2447_v14 = vpop.eup %2446  ;;  %1350 = vadd.xlane.f32.xlu0 %v1349_v13 }
 0xcc2   :  { %v1352_v16 = vsel %vm468_vm2, %v2447_v14, 0.0 }
 0xcc3   :  { %v2449_v18 = vpop.eup %2448  ;;  %1353 = vadd.xlane.f32.xlu1 %v1352_v16 }
 0xcc4   :  { %v1355_v21 = vsel %vm468_vm2, %v2449_v18, 0.0 }
 0xcc5   :  { %v2451_v22 = vpop.eup %2450  ;;  %1356 = vadd.xlane.f32.xlu0 %v1355_v21  ;;  %v2052_v21 = vld [vmem:[%s3095_s13 + $0x1] ss:$0 sm:$0xff] }
 0xcc6   :  { %v1358_v24 = vsel %vm468_vm2, %v2451_v22, 0.0 }
 0xcc7   :  { %1359 = vadd.xlane.f32.xlu1 %v1358_v24 }
 0xd4e   :  { %v1351_v26 = vpop.xlane.xlu0 %1350 }
 0xd4f   :  { %2452 = vrcp.f32 %v1351_v26 }
 0xd50   :  { %v1354_v27 = vpop.xlane.xlu1 %1353 }
 0xd51   :  { %2454 = vrcp.f32 %v1354_v27  ;;  %v2053_v27 = vld [vmem:[%s3096_s14 + $0x1] ss:$0 sm:$0xff] }
 0xd52   :  { %v1357_v28 = vpop.xlane.xlu0 %1356 }
 0xd53   :  { %2456 = vrcp.f32 %v1357_v28 }
 0xd54   :  { %v1360_v29 = vpop.xlane.xlu1 %1359 }
 0xd55   :  { %2458 = vrcp.f32 %v1360_v29 }
 0xd59   :  { %v2453_v30 = vpop.eup %2452 }
 0xd5a   :  { %v1365_v34 = vmul.f32 %v2453_v30, %v2445_v12 }
 0xd5b   :  { %v2455_v32 = vpop.eup %2454 }
 0xd5c   :  { %v1366_v35 = vmul.f32 %v2455_v32, %v2447_v14 }
 0xd5d   :  { %v2457_v36 = vpop.eup %2456 }
 0xd5e   :  { %v1369_v37 = vpack.c.bf16 %v1366_v35, %v1365_v34  ;;  %v1367_v39 = vmul.f32 %v2457_v36, %v2449_v18  ;;  %v2398_v34 = vld [vmem:[%s3099_s17 + $0x40] sm:$0xff]   ;;  %v2399_v35 = vld [vmem:[%s3099_s17 + $0x48] sm:$0xff]   ;;  %v2400_v36 = vld [vmem:[%s3099_s17 + $0x50] sm:$0xff]  }
 0xd5f   :  { %v2459_v38 = vpop.eup %2458 }
 0xd60   :  { %v1368_v40 = vmul.f32 %v2459_v38, %v2451_v22  ;;  %2300 = vmatprep.mubr.msk.bf16.mxu0 %vm468_vm2, %v1369_v37  ;;  %v2401_v37 = vld [vmem:[%s3099_s17 + $0x58] sm:$0xff]   ;;  %v2402_v38 = vld [vmem:[%s3099_s17 + $0x60] sm:$0xff]  }
 0xd62   :  { %v1370_v5 = vpack.c.bf16 %v1368_v40, %v1367_v39  ;;  %v2403_v39 = vld [vmem:[%s3099_s17 + $0x68] sm:$0xff]   ;;  %v2404_v40 = vld [vmem:[%s3099_s17 + $0x70] sm:$0xff]  }
 0xd64   :  { %2301 = vmatmul.mubr.msk.bf16.vlgmr.msra.gmra.mrb[32].mxu0 %vm468_vm2, %v1370_v5  ;;  %v2059_v5 = vld [vmem:[%s3098_s16 + $0x1] ss:$0 sm:$0xff] }
 0xd65   :  { %2313 = vmatpush3.bf16.msra.mxu0 %v2392_v41  ;;  %2316 = vmatprep.mubr.msk.bf16.mxu0 %vm2514_vm1, %v2513_v20  ;;  %v2405_v41 = vld [vmem:[%s3099_s17 + $0x78] sm:$0xff]  }
 0xd66   :  { %2314 = vmatprep.subr.bf16.mxu0 %v2513_v20 }
 0xd69   :  { %2315 = vmatpush3.bf16.msra.mxu0 %v2394_v43 }
 0xd6a   :  { %2328 = vmatprep.subr.bf16.mxu0 %v2513_v20 }
 0xe37   :  { %v2302_v45 = vpop.f32.mrb[32].mxu0 }
 0xe38   :  { %v1412_v46 = vpop.f32.mrb[33].mxu0 }
 0xe39   :  { %v2303_v47 = vpop.f32.mrb[34].mxu0 }
 0xe3a   :  { %v1499_v48 = vpack.c.bf16 %v2303_v47, %v2302_v45  ;;  %v1415_v31 = vpop.f32.mrb[35].mxu0 }
 0xe3b   :  { %v1429_v49 = vpack.c.bf16 %v1415_v31, %v1412_v46 }
 0xe3c   :  { %2317 = vmatmul.mubr.msk.bf16.vlgmr.msra.gmra.mrb[36].mxu0 %vm101_vm0, %v1499_v48 }
 0xe3d   :  { %2309 = vmatmul.mubr.msk.bf16.vlgmr.msra.gmra.mrb[28].mxu1 %vm101_vm0, %v1429_v49  ;;  %2344 = vmatprep.mubr.msk.bf16.mxu0 %vm2514_vm1, %v2513_v20 }
 0xe3e   :  { %2324 = vmatprep.mubr.msk.bf16.mxu1 %vm2514_vm1, %v2513_v20  ;;  %2321 = vmatpush3.bf16.msra.mxu1 %v2396_v9 }
 0xe3f   :  { %2322 = vmatprep.subr.bf16.mxu1 %v2513_v20  ;;  %2329 = vmatpush3.bf16.msra.mxu0 %v2398_v34 }
 0xe40   :  { %2330 = vmatprep.subr.bf16.mxu0 %v2513_v20 }
 0xe42   :  { %2323 = vmatpush3.bf16.msra.mxu1 %v2397_v23 }
 0xe43   :  { %2348 = vmatprep.subr.bf16.mxu1 %v2513_v20  ;;  %2331 = vmatpush3.bf16.msra.mxu0 %v2399_v35 }
 0xe44   :  { %2332 = vmatprep.subr.bf16.mxu0 %v2513_v20 }
 0xe47   :  { %2333 = vmatpush3.bf16.msra.mxu0 %v2400_v36 }
 0xe48   :  { %2334 = vmatprep.subr.bf16.mxu0 %v2513_v20 }
 0xe4b   :  { %2335 = vmatpush3.bf16.msra.mxu0 %v2401_v37 }
 0xe4c   :  { %2336 = vmatprep.subr.bf16.mxu0 %v2513_v20 }
 0xe4f   :  { %2337 = vmatpush3.bf16.msra.mxu0 %v2402_v38 }
 0xe50   :  { %2338 = vmatprep.subr.bf16.mxu0 %v2513_v20 }
 0xe53   :  { %2339 = vmatpush3.bf16.msra.mxu0 %v2403_v39 }
 0xe54   :  { %2340 = vmatprep.subr.bf16.mxu0 %v2513_v20 }
 0xe57   :  { %2341 = vmatpush3.bf16.msra.mxu0 %v2404_v40 }
 0xe58   :  { %2342 = vmatprep.subr.bf16.mxu0 %v2513_v20 }
 0xe5b   :  { %2343 = vmatpush3.bf16.msra.mxu0 %v2405_v41 }
 0xf0f   :  { %v1554_v33 = vpop.f32.mrb[36].mxu0 }
 0xf10   :  { %v1484_v51 = vpop.f32.mrb[28].mxu1  ;;  %v2318_v52 = vpop.f32.mrb[37].mxu0 }
 0xf11   :  { %v1497_v53 = vadd.f32 %v2042_v50, %v1484_v51  ;;  %v2310_v54 = vpop.f32.mrb[29].mxu1  ;;  %v1557_v55 = vpop.f32.mrb[38].mxu0 }
 0xf12   :  { %v1487_v56 = vpop.f32.mrb[30].mxu1  ;;  %v2319_v57 = vpop.f32.mrb[39].mxu0 }
 0xf13   :  { %v1561_v58 = vadd.f32 %v1554_v33, %v1497_v53  ;;  %v1498_v59 = vadd.f32 %v2042_v50, %v1487_v56  ;;  %v2311_v60 = vpop.f32.mrb[31].mxu1 }
 0xf14   :  { %v2082_v60 = vld [vmem:[%s3100_s18 + $0x1] ss:$0 sm:$0xff]  ;;  %s1817_s18 = scalar_lea.vmem [#allocation2], %s1816_s5 }
 0xf15   :  { %v2985_v61 = vadd.f32 %v1561_v58, %v2863_v3  ;;  %v1562_v62 = vadd.f32 %v1557_v55, %v1498_v59 }
 0xf17   :  { %v2988_v63 = vadd.f32 %v1562_v62, %v2866_v42  ;;  %v1569_v0 = vsel %vm101_vm0, %v2985_v61, 0.0 }
 0xf18   :  { %1570 = vadd.xlane.f32.xlu0 %v1569_v0 }
 0xf19   :  { %v1572_v1 = vsel %vm101_vm0, %v2988_v63, 0.0 }
 0xf1a   :  { %1573 = vadd.xlane.f32.xlu1 %v1572_v1 }
 0xfa5   :  { %v1571_v15 = vpop.xlane.xlu0 %1570 }
 0xfa6   :  { %v1575_v2 = vmul.f32 0.03125, %v1571_v15 }
 0xfa7   :  { %v1574_v4 = vpop.xlane.xlu1 %1573 }
 0xfa8   :  { %v1577_v17 = vsub.f32 %v2985_v61, %v1575_v2  ;;  %v1576_v6 = vmul.f32 0.03125, %v1574_v4 }
 0xfaa   :  { %v1578_v3 = vsub.f32 %v2988_v63, %v1576_v6  ;;  %v1579_v19 = vmul.f32 %v1577_v17, %v1577_v17 }
 0xfac   :  { %v1581_v42 = vsel %vm101_vm0, %v1579_v19, 0.0  ;;  %v1580_v7 = vmul.f32 %v1578_v3, %v1578_v3 }
 0xfad   :  { %1582 = vadd.xlane.f32.xlu0 %v1581_v42 }
 0xfae   :  { %v1584_v8 = vsel %vm101_vm0, %v1580_v7, 0.0 }
 0xfaf   :  { %1585 = vadd.xlane.f32.xlu1 %v1584_v8 }
0x103a   :  { %v1583_v10 = vpop.xlane.xlu0 %1582 }
0x103b   :  { %v1587_v11 = vmul.f32 0.03125, %v1583_v10 }
0x103c   :  { %v1586_v12 = vpop.xlane.xlu1 %1585 }
0x103d   :  { %v1589_v13 = vadd.f32 1e-05, %v1587_v11  ;;  %v1588_v14 = vmul.f32 0.03125, %v1586_v12  ;;  %v2407_v12 = vld [vmem:[%s3103_s21 + $0x8] sm:$0xff]  }
0x103f   :  { %2460 = vrsqrt.f32 %v1589_v13  ;;  %v1590_v16 = vadd.f32 1e-05, %v1588_v14 }
0x1041   :  { %2462 = vrsqrt.f32 %v1590_v16 }
0x1049   :  { %v2461_v18 = vpop.eup %2460 }
0x104a   :  { %v1593_v22 = vmul.f32 %v2461_v18, %v1577_v17 }
0x104b   :  { %v2463_v24 = vpop.eup %2462 }
0x104c   :  { %v1601_v25 = vmul.f32 %v2052_v21, %v1593_v22  ;;  %v1594_v26 = vmul.f32 %v2463_v24, %v1578_v3  ;;  %v2093_v24 = vld [vmem:[%s3102_s20] ss:$0 sm:$0xff] }
0x104e   :  { %v1602_v28 = vmul.f32 %v2052_v21, %v1594_v26  ;;  %v1609_v29 = vadd.f32 %v2053_v27, %v1601_v25  ;;  %v2092_v21 = vld [vmem:[%s3101_s19] ss:$0 sm:$0xff] }
0x1050   :  { %v1610_v30 = vadd.f32 %v2053_v27, %v1602_v28 }
0x1052   :  { %v1611_v32 = vpack.c.bf16 %v1610_v30, %v1609_v29 }
0x1054   :  { %2325 = vmatmul.mubr.msk.bf16.vlgmr.msra.gmra.mrb[32].mxu1 %vm101_vm0, %v1611_v32 }
0x1055   :  { %2352 = vmatprep.mubr.msk.bf16.mxu1 %vm2514_vm1, %v2513_v20 }
0x1127   :  { %v1674_v43 = vpop.f32.mrb[32].mxu1 }
0x1128   :  { %v1675_v44 = vadd.f32 %v2059_v5, %v1674_v43  ;;  %v2326_v45 = vpop.f32.mrb[33].mxu1 }
0x1129   :  { %v1677_v46 = vpop.f32.mrb[34].mxu1 }
0x112a   :  { %v2063_v47 = vmul.f32 -1.702, %v1675_v44  ;;  %v1678_v48 = vadd.f32 %v2059_v5, %v1677_v46  ;;  %v2327_v31 = vpop.f32.mrb[35].mxu1 }
0x112c   :  { %v1685_v49 = vmul.f32 1.442695, %v2063_v47  ;;  %v2064_v50 = vmul.f32 -1.702, %v1678_v48 }
0x112e   :  { %2464 = vpow2.f32 %v1685_v49  ;;  %v1687_v33 = vmul.f32 1.442695, %v2064_v50 }
0x1130   :  { %2466 = vpow2.f32 %v1687_v33 }
0x1138   :  { %v2465_v51 = vpop.eup %2464 }
0x1139   :  { %v1689_v52 = vadd.f32 1.0, %v2465_v51 }
0x113a   :  { %v2467_v53 = vpop.eup %2466 }
0x113b   :  { %2468 = vrcp.f32 %v1689_v52  ;;  %v1690_v54 = vadd.f32 1.0, %v2467_v53 }
0x113d   :  { %2470 = vrcp.f32 %v1690_v54 }
0x1145   :  { %v2469_v55 = vpop.eup %2468 }
0x1146   :  { %v1695_v57 = vmul.f32 %v2469_v55, %v1675_v44 }
0x1147   :  { %v2471_v56 = vpop.eup %2470 }
0x1148   :  { %v1696_v58 = vmul.f32 %v2471_v56, %v1678_v48 }
0x114a   :  { %v1697_v59 = vpack.c.bf16 %v1696_v58, %v1695_v57 }
0x114c   :  { %2345 = vmatmul.mubr.bf16.vlgmr.msra.gmra.mrb[40].mxu0 %v1697_v59 }
0x121f   :  { %v1805_v62 = vpop.f32.mrb[40].mxu0 }
0x1220   :  { %v1806_v0 = vadd.f32 %v2082_v60, %v1805_v62  ;;  %v2346_v1 = vpop.f32.mrb[41].mxu0 }
0x1221   :  { %v1808_v15 = vpop.f32.mrb[42].mxu0 }
0x1222   :  { %v1812_v2 = vadd.f32 %v1806_v0, %v2985_v61  ;;  %v1809_v4 = vadd.f32 %v2082_v60, %v1808_v15  ;;  %v2347_v17 = vpop.f32.mrb[43].mxu0 }
0x1224   :  { %1814 = vst.msk [vmem:[#allocation2] sm:$0xff] %vm101_vm0, %v1812_v2  ;;  %v1813_v6 = vadd.f32 %v1809_v4, %v2988_v63  ;;  %v2406_v63 = vld [vmem:[%s3103_s21] sm:$0xff]   ;;  %s2515_s21 = smov [#allocation6]  }
0x1225   :  { %2349 = vmatpush3.bf16.msra.mxu1 %v2406_v63  ;;  %s1924_s7 = sshll.u32 %s2515_s21, 4  ;;  %s1925_s7 = int_to_ptr.vmem [resolvable:$true] %s1924_s7 }
0x1226   :  { %1815 = vst.msk [vmem:[#allocation2 + $0x8] sm:$0xff] %vm101_vm0, %v1813_v6  ;;  %2350 = vmatprep.subr.bf16.mxu1 %v2513_v20  ;;  %s2486_s8 = scalar_lea.vmem %s1925_s7, 32  ;;  %p2491_p6 = scmp.lt.s32.totalorder %s1925_s7, %s1925_s7 }
0x1227   :  { %p2487_p5 = scmp.ne.s32.totalorder %s1925_s7, %s2486_s8  ;;  %p2492_p7 = scmp.lt.s32.totalorder %s2486_s8, %s2486_s8 }
0x1229   :  { %2351 = vmatpush3.bf16.msra.mxu1 %v2407_v12  ;;  %p2493_p8 = por %p2492_p7, %p2491_p6 }
0x122b   :  { %p2494_p9 = pnand %p2493_p8, %p2487_p5 }
0x122d   :  { %v1821_v3 = vld [vmem:[%s1820_s25] sm:$0x1] }
0x122e   :  { %v1823_v19 = vrot.slane %v1821_v3, 7  ;;  %v1818_v42 = vld [vmem:[%s1817_s18] sm:$0x1] }
0x1230   :  { %v1826_v7 = vsel %vm1825_vm3, %v1818_v42, %v1823_v19 }
0x1231   :  { %v1830_v8 = vsel %vm1829_vm4, %v1826_v7, 0.0 }
0x1232   :  { %1831 = vadd.xlane.f32.xlu0 %v1830_v8 }
0x12bf   :  { %v1832_v61 = vpop.xlane.xlu0 %1831 }
0x12c0   :  { %v1833_v9 = vmul.f32 0.03125, %v1832_v61 }
0x12c2   :  { %v1834_v23 = vsub.f32 %v1826_v7, %v1833_v9 }
0x12c4   :  { %v1835_v10 = vmul.f32 %v1834_v23, %v1834_v23 }
0x12c6   :  { %v1836_v11 = vsel %vm1829_vm4, %v1835_v10, 0.0 }
0x12c7   :  { %1837 = vadd.xlane.f32.xlu1 %v1836_v11 }
0x1354   :  { %v1838_v13 = vpop.xlane.xlu1 %1837 }
0x1355   :  { %v1839_v14 = vmul.f32 0.03125, %v1838_v13 }
0x1357   :  { %v1840_v16 = vadd.f32 1e-05, %v1839_v14 }
0x1359   :  { %2472 = vrsqrt.f32 %v1840_v16 }
0x1363   :  { %v2473_v18 = vpop.eup %2472 }
0x1364   :  { %v1842_v22 = vmul.f32 %v2473_v18, %v1834_v23 }
0x1366   :  { %v1849_v20 = vmul.f32 %v2092_v21, %v1842_v22 }
0x1368   :  { %v1856_v25 = vadd.f32 %v2093_v24, %v1849_v20 }
0x136a   :  { %v1857_v26 = vpack.c.bf16 %v1856_v25, %v1856_v25 }
0x136c   :  { %2353 = vmatmul.mubr.msk.bf16.vlgmr.msra.gmra.mrb[36].mxu1 %vm101_vm0, %v1857_v26 }
0x143f   :  { %v1911_v27 = vpop.f32.mrb[36].mxu1 }
0x1440   :  { %1917 = vst [vmem:[#allocation6] sm:$0x3] %v1911_v27  ;;  %v2354_v28 = vpop.f32.mrb[37].mxu1 }
0x1441   :  { %v1914_v29 = vpop.f32.mrb[38].mxu1 }
0x1442   :  { %2497 = shalt.err (!%p2494_p9)
}
0x1443   :  { %s2498_s10 = scalar_lea.hbm %s3105_s23, 32 }
0x1444   :  { %p2499_p10 = scmp.ne.s32.totalorder %s3105_s23, %s2498_s10  ;;  %p2502_p11 = scmp.lt.u32.totalorder %s2498_s10, %s3105_s23 }
0x1446   :  { %p2504_p12 = pnand %p2502_p11, %p2499_p10 }
0x1448   :  { %2507 = shalt.err (!%p2504_p12)
}
0x1449   :  { %1927 = dma.vmem_to_hbm [thread:$0]  %s1925_s7, 32, %s3105_s23, [#allocation4]   ;;  %v2355_v30 = vpop.f32.mrb[39].mxu1 }
0x144a   :  { %2510 = dma.done.wait [#allocation4], 32  }
0x144b   :  { %2511 = vsyncadd [#allocation4], 4294967264 }
0x144c   :  { %1931 = vsyncpa [#allocation4], 1 }
0x144d   :  { %1932 = vsyncpa [#allocation5], 1 }

</bundles_post_ra>
